<compile_context>
chip_gen: v6e
topology: v6e:2x2x1
jax: 0.10.0
libtpu: 0.0.40
codegen_flags: <defaults>
</compile_context>

<pallas_src>
import functools

import jax
import jax.numpy as jnp
import numpy as np
from jax.experimental import pallas as pl
from jax.experimental.pallas import tpu as pltpu


def fusion_kernel(x_ref, w_ih0_ref, w_rec_ref, b_ref,
                  w1m_ref, w1s_ref, b1_ref, w2_ref, b2_ref, out_ref,
                  *, T, H, L):
    """Whole forward pass in one kernel invocation.

    x_ref   : (T, B, D) time-major input, f32.
    w_ih0   : (D, 4H)   bf16, layer-0 input weights, gate order (i, f, o, g).
    w_rec   : (L*H, L*4H) bf16, block-bidiagonal fused recurrent weight:
              row block l = [.. 0 .., W_hh_l (col l), W_ih_{l+1} (col l+1), .. 0 ..].
    b_ref   : (L, 4H) f32, per-layer (b_ih + b_hh), gate order (i, f, o, g).
    """
    x = x_ref[...]                                    # (T, B, D) f32
    B = x.shape[1]
    D = x.shape[2]

    # ---- hoisted layer-0 input projection (off the serial chain) -----------
    x_flat = x.reshape(T * B, D).astype(jnp.bfloat16)
    x_proj = (jnp.dot(x_flat, w_ih0_ref[...],
                      preferred_element_type=jnp.float32)
              + b_ref[0:1, :]).reshape(T, B, 4 * H)   # (T, B, 4H) f32

    w_rec = w_rec_ref[...]                            # (L*H, L*4H) bf16

    # ---- wave-pipelined multi-layer LSTM, zero initial (h, c) (hx=None) -----
    h = [jnp.zeros((B, H), jnp.float32) for _ in range(L)]
    c = [jnp.zeros((B, H), jnp.float32) for _ in range(L)]
    # T + L - 1 super-steps; unrolled Python loop is fine at these sizes.  For
    # large T, switch to lax.fori_loop(..., unroll=True) carrying (h, c) with
    # x_proj held in a VMEM scratch ref to bound vreg live ranges.
    for s in range(T + L - 1):
        # One fused recurrent matmul feeds every active layer this super-step.
        lhs = jnp.concatenate(h, axis=1).astype(jnp.bfloat16)            # (B, L*H)
        g_all = jnp.dot(lhs, w_rec, preferred_element_type=jnp.float32)  # (B, L*4H)
        new_h = list(h)
        new_c = list(c)
        for l in range(L):
            t_l = s - l                               # layer l computes step s - l
            if not (0 <= t_l < T):
                continue
            gates = g_all[:, l * 4 * H:(l + 1) * 4 * H]      # 128-lane-aligned slab
            if l == 0:
                gates = gates + x_proj[t_l]           # bias already folded in
            else:
                gates = gates + b_ref[l:l + 1, :]
            sig = jax.nn.sigmoid(gates[:, :3 * H])    # i, f, o in one EUP push
            g_g = jnp.tanh(gates[:, 3 * H:])          # g in one EUP push
            i_g = sig[:, :H]
            f_g = sig[:, H: 2 * H]
            o_g = sig[:, 2 * H: 3 * H]
            new_c[l] = f_g * c[l] + i_g * g_g
            new_h[l] = o_g * jnp.tanh(new_c[l])
        h, c = new_h, new_c
    h_last = h[L - 1]                                 # == r_out[:, -1, :]

    # ---- statistic pooling on the raw f32 input (off the critical path) ----
    mean = jnp.mean(x, axis=0)                        # (B, D)
    k = jnp.sum((x - mean + 1e-9) ** 2, axis=0)       # (B, D)
    std = jnp.sqrt(k)

    # ---- fc_1 -> relu -> residual add -> fc (all f32) ------------------------
    feat = (jnp.dot(mean, w1m_ref[...], preferred_element_type=jnp.float32)
            + jnp.dot(std, w1s_ref[...], preferred_element_type=jnp.float32)
            + b1_ref[...])
    feat = jnp.maximum(feat, 0.0) + h_last
    out = jnp.dot(feat, w2_ref[...], preferred_element_type=jnp.float32) + b2_ref[...]
    out_ref[...] = out.astype(out_ref.dtype)


def _stack_gates_w(w):
    """(4, in, H) in PyTorch order (i, f, g, o) -> (in, 4H) in order (i, f, o, g)."""
    return jnp.concatenate([w[0], w[1], w[3], w[2]], axis=1)


def _stack_gates_b(b):
    """(4, 1, H) in order (i, f, g, o) -> (1, 4H) in order (i, f, o, g)."""
    return jnp.concatenate([b[0], b[1], b[3], b[2]], axis=1)


def early_fusion_reslstm(x, lstm_params, w_fc1, b_fc1, w_fc, b_fc):
    """x: (B, T, D) batch-first.  lstm_params: list of (w_ih (4,D_l,H),
    w_hh (4,H,H), b (4,1,H)) in PyTorch gate order (i, f, g, o), b = b_ih+b_hh."""
    B, T, D = x.shape
    L = len(lstm_params)
    H = lstm_params[0][1].shape[-1]
    C = w_fc.shape[-1]

    # All layout plumbing / weight fusion happens here (free), not in-kernel.
    x_tm = jnp.transpose(x, (1, 0, 2))                               # (T, B, D)
    w_ih0 = _stack_gates_w(lstm_params[0][0]).astype(jnp.bfloat16)   # (D, 4H)
    b_all = jnp.concatenate([_stack_gates_b(b) for (_, _, b) in lstm_params],
                            axis=0)                                  # (L, 4H) f32

    # Block-bidiagonal fused recurrent weight (L*H, L*4H):
    #   rows l*H:(l+1)*H,  cols l*4H:(l+1)*4H   <- W_hh_l
    #   rows l*H:(l+1)*H,  cols (l+1)*4H:(l+2)*4H <- W_ih_{l+1}
    rows = []
    for l in range(L):
        row = []
        for m in range(L):
            if m == l:
                row.append(_stack_gates_w(lstm_params[l][1]))        # W_hh_l
            elif m == l + 1:
                row.append(_stack_gates_w(lstm_params[m][0]))        # W_ih_{l+1}
            else:
                row.append(jnp.zeros((H, 4 * H), jnp.float32))
        rows.append(jnp.concatenate(row, axis=1))
    w_rec = jnp.concatenate(rows, axis=0).astype(jnp.bfloat16)       # (L*H, L*4H)

    args = [x_tm, w_ih0, w_rec, b_all,
            w_fc1[:D], w_fc1[D:], b_fc1, w_fc, b_fc]   # fc_1 split: mean / std halves

    kernel = functools.partial(fusion_kernel, T=T, H=H, L=L)
    vmem = pl.BlockSpec(memory_space=pltpu.MemorySpace.VMEM)
    return pl.pallas_call(
        kernel,
        out_shape=jax.ShapeDtypeStruct((B, C), jnp.float32),
        in_specs=[vmem] * len(args),
        out_specs=vmem,
    )(*args)


def reference_forward(x, lstm_params, w_fc1, b_fc1, w_fc, b_fc):
    """Pure-JAX f32 reference with identical semantics (for validation)."""
    B, T, D = x.shape
    H = lstm_params[0][1].shape[-1]

    seq = x
    h = None
    for (w_ih, w_hh, b) in lstm_params:
        h = jnp.zeros((B, H), jnp.float32)
        c = jnp.zeros((B, H), jnp.float32)
        outs = []
        for t in range(T):
            x_t = seq[:, t, :]
            gi = x_t @ w_ih[0] + h @ w_hh[0] + b[0]
            gf = x_t @ w_ih[1] + h @ w_hh[1] + b[1]
            gg = x_t @ w_ih[2] + h @ w_hh[2] + b[2]
            go = x_t @ w_ih[3] + h @ w_hh[3] + b[3]
            c = jax.nn.sigmoid(gf) * c + jax.nn.sigmoid(gi) * jnp.tanh(gg)
            h = jax.nn.sigmoid(go) * jnp.tanh(c)
            outs.append(h)
        seq = jnp.stack(outs, axis=1)
    h_last = h

    mean = jnp.mean(x, axis=1, keepdims=True)
    std = jnp.sqrt(jnp.sum((x - mean + 1e-9) ** 2, axis=1))
    seg = jnp.concatenate([mean[:, 0, :], std], axis=1)

    feat = jnp.maximum(seg @ w_fc1 + b_fc1, 0.0) + h_last
    return feat @ w_fc + b_fc


if __name__ == "__main__":
    # cfg-implied small shapes:
    #   FEATURE_DIMS=8, MODALITY.NUMS=2 -> D = 16
    #   MODEL.LSTM.DIM_HIDDEN = 32, NUM_LAYERS = 2, NUM_CLASSES = 4
    B, T, D, H, L, C = 2, 8, 16, 32, 2, 4

    key = jax.random.PRNGKey(0)
    keys = jax.random.split(key, 5 + 4 * L)

    x = jax.random.normal(keys[0], (B, T, D), dtype=jnp.float32)

    scale = 1.0 / np.sqrt(H)
    lstm_params = []
    kidx = 1
    for layer in range(L):
        d_in = D if layer == 0 else H
        w_ih = jax.random.uniform(keys[kidx], (4, d_in, H), jnp.float32, -scale, scale); kidx += 1
        w_hh = jax.random.uniform(keys[kidx], (4, H, H), jnp.float32, -scale, scale); kidx += 1
        b_ih = jax.random.uniform(keys[kidx], (4, 1, H), jnp.float32, -scale, scale); kidx += 1
        b_hh = jax.random.uniform(keys[kidx], (4, 1, H), jnp.float32, -scale, scale); kidx += 1
        lstm_params.append((w_ih, w_hh, b_ih + b_hh))

    s1 = 1.0 / np.sqrt(2 * D)
    w_fc1 = jax.random.uniform(keys[kidx], (2 * D, H), jnp.float32, -s1, s1); kidx += 1
    b_fc1 = jax.random.uniform(keys[kidx], (1, H), jnp.float32, -s1, s1); kidx += 1
    s2 = 1.0 / np.sqrt(H)
    w_fc = jax.random.uniform(keys[kidx], (H, C), jnp.float32, -s2, s2); kidx += 1
    b_fc = jax.random.uniform(keys[kidx], (1, C), jnp.float32, -s2, s2)

    out = early_fusion_reslstm(x, lstm_params, w_fc1, b_fc1, w_fc, b_fc)
    out = jax.block_until_ready(out)

    ref = reference_forward(x, lstm_params, w_fc1, b_fc1, w_fc, b_fc)
    # Tolerance relaxed vs. the pure-f32 version: LSTM matmul operands are
    # bf16 (f32 accumulation), as recommended by the perf review.
    np.testing.assert_allclose(np.asarray(out), np.asarray(ref), rtol=2e-2, atol=2e-2)
    assert out.shape == (B, C)

    print("KERNEL_OK")
</pallas_src>

<mosaic_0001>
module attributes {stable_mosaic.version = 11 : i64} {
  func.func @fusion_kernel(%arg0: memref<8x2x16xf32, #tpu.memory_space<vmem>>, %arg1: memref<16x128xbf16, #tpu.memory_space<vmem>>, %arg2: memref<64x256xbf16, #tpu.memory_space<vmem>>, %arg3: memref<2x128xf32, #tpu.memory_space<vmem>>, %arg4: memref<16x32xf32, #tpu.memory_space<vmem>>, %arg5: memref<16x32xf32, #tpu.memory_space<vmem>>, %arg6: memref<1x32xf32, #tpu.memory_space<vmem>>, %arg7: memref<32x4xf32, #tpu.memory_space<vmem>>, %arg8: memref<1x4xf32, #tpu.memory_space<vmem>>, %arg9: memref<2x4xf32, #tpu.memory_space<vmem>>) attributes {dimension_semantics = [], scalar_prefetch = 0 : i64, scratch_operands = 0 : i64, tpu.core_type = #tpu.core_type<tc>} {
    %c0 = arith.constant 0 : index
    %c0_0 = arith.constant 0 : index
    %c0_1 = arith.constant 0 : index
    %0 = vector.load %arg0[%c0, %c0_0, %c0_1] : memref<8x2x16xf32, #tpu.memory_space<vmem>>, vector<8x2x16xf32>
    %1 = vector.shape_cast %0 : vector<8x2x16xf32> to vector<16x16xf32>
    %2 = arith.truncf %1 : vector<16x16xf32> to vector<16x16xbf16>
    %c0_2 = arith.constant 0 : index
    %c0_3 = arith.constant 0 : index
    %3 = vector.load %arg1[%c0_2, %c0_3] : memref<16x128xbf16, #tpu.memory_space<vmem>>, vector<16x128xbf16>
    %cst = arith.constant dense<0.000000e+00> : vector<16x128xf32>
    %4 = tpu.matmul %2, %3, %cst {dimension_numbers = #tpu.dot_dimension_numbers<[1], [0], [0], [1], [0, 0, 1, 1], [], []>} : vector<16x16xbf16>, vector<16x128xbf16>, vector<16x128xf32> -> vector<16x128xf32>
    %c0_4 = arith.constant 0 : index
    %c0_5 = arith.constant 0 : index
    %5 = vector.load %arg3[%c0_4, %c0_5] : memref<2x128xf32, #tpu.memory_space<vmem>>, vector<1x128xf32>
    %6 = vector.broadcast %5 : vector<1x128xf32> to vector<16x128xf32>
    %7 = arith.addf %4, %6 : vector<16x128xf32>
    %8 = vector.shape_cast %7 : vector<16x128xf32> to vector<8x2x128xf32>
    %c0_6 = arith.constant 0 : index
    %c0_7 = arith.constant 0 : index
    %9 = vector.load %arg2[%c0_6, %c0_7] : memref<64x256xbf16, #tpu.memory_space<vmem>>, vector<64x256xbf16>
    %cst_8 = arith.constant 0.000000e+00 : f32
    %10 = vector.broadcast %cst_8 : f32 to vector<2x32xf32>
    %cst_9 = arith.constant 0.000000e+00 : f32
    %11 = vector.broadcast %cst_9 : f32 to vector<2x32xf32>
    %cst_10 = arith.constant 0.000000e+00 : f32
    %12 = vector.broadcast %cst_10 : f32 to vector<2x32xf32>
    %cst_11 = arith.constant 0.000000e+00 : f32
    %13 = vector.broadcast %cst_11 : f32 to vector<2x32xf32>
    %14 = tpu.concatenate %10, %11 in 1 : vector<2x32xf32>, vector<2x32xf32> -> vector<2x64xf32>
    %15 = arith.truncf %14 : vector<2x64xf32> to vector<2x64xbf16>
    %cst_12 = arith.constant dense<0.000000e+00> : vector<2x256xf32>
    %16 = tpu.matmul %15, %9, %cst_12 {dimension_numbers = #tpu.dot_dimension_numbers<[1], [0], [0], [1], [0, 0, 1, 1], [], []>} : vector<2x64xbf16>, vector<64x256xbf16>, vector<2x256xf32> -> vector<2x256xf32>
    %17 = vector.extract_strided_slice %16 {offsets = [0, 0], sizes = [2, 128], strides = [1, 1]} : vector<2x256xf32> to vector<2x128xf32>
    %18 = vector.extract_strided_slice %8 {offsets = [0, 0, 0], sizes = [1, 2, 128], strides = [1, 1, 1]} : vector<8x2x128xf32> to vector<1x2x128xf32>
    %19 = vector.shape_cast %18 : vector<1x2x128xf32> to vector<2x128xf32>
    %20 = arith.addf %17, %19 : vector<2x128xf32>
    %21 = vector.extract_strided_slice %20 {offsets = [0, 0], sizes = [2, 96], strides = [1, 1]} : vector<2x128xf32> to vector<2x96xf32>
    %22 = arith.negf %21 : vector<2x96xf32>
    %23 = math.exp %22 : vector<2x96xf32>
    %cst_13 = arith.constant 1.000000e+00 : f32
    %24 = vector.broadcast %cst_13 : f32 to vector<2x96xf32>
    %25 = arith.addf %24, %23 : vector<2x96xf32>
    %26 = arith.divf %24, %25 : vector<2x96xf32>
    %27 = vector.extract_strided_slice %20 {offsets = [0, 96], sizes = [2, 32], strides = [1, 1]} : vector<2x128xf32> to vector<2x32xf32>
    %28 = math.tanh %27 : vector<2x32xf32>
    %29 = vector.extract_strided_slice %26 {offsets = [0, 0], sizes = [2, 32], strides = [1, 1]} : vector<2x96xf32> to vector<2x32xf32>
    %30 = vector.extract_strided_slice %26 {offsets = [0, 32], sizes = [2, 32], strides = [1, 1]} : vector<2x96xf32> to vector<2x32xf32>
    %31 = vector.extract_strided_slice %26 {offsets = [0, 64], sizes = [2, 32], strides = [1, 1]} : vector<2x96xf32> to vector<2x32xf32>
    %32 = arith.mulf %30, %12 : vector<2x32xf32>
    %33 = arith.mulf %29, %28 : vector<2x32xf32>
    %34 = arith.addf %32, %33 : vector<2x32xf32>
    %35 = math.tanh %34 : vector<2x32xf32>
    %36 = arith.mulf %31, %35 : vector<2x32xf32>
    %37 = tpu.concatenate %36, %11 in 1 : vector<2x32xf32>, vector<2x32xf32> -> vector<2x64xf32>
    %38 = arith.truncf %37 : vector<2x64xf32> to vector<2x64xbf16>
    %cst_14 = arith.constant dense<0.000000e+00> : vector<2x256xf32>
    %39 = tpu.matmul %38, %9, %cst_14 {dimension_numbers = #tpu.dot_dimension_numbers<[1], [0], [0], [1], [0, 0, 1, 1], [], []>} : vector<2x64xbf16>, vector<64x256xbf16>, vector<2x256xf32> -> vector<2x256xf32>
    %40 = vector.extract_strided_slice %39 {offsets = [0, 0], sizes = [2, 128], strides = [1, 1]} : vector<2x256xf32> to vector<2x128xf32>
    %41 = vector.extract_strided_slice %8 {offsets = [1, 0, 0], sizes = [1, 2, 128], strides = [1, 1, 1]} : vector<8x2x128xf32> to vector<1x2x128xf32>
    %42 = vector.shape_cast %41 : vector<1x2x128xf32> to vector<2x128xf32>
    %43 = arith.addf %40, %42 : vector<2x128xf32>
    %44 = vector.extract_strided_slice %43 {offsets = [0, 0], sizes = [2, 96], strides = [1, 1]} : vector<2x128xf32> to vector<2x96xf32>
    %45 = arith.negf %44 : vector<2x96xf32>
    %46 = math.exp %45 : vector<2x96xf32>
    %cst_15 = arith.constant 1.000000e+00 : f32
    %47 = vector.broadcast %cst_15 : f32 to vector<2x96xf32>
    %48 = arith.addf %47, %46 : vector<2x96xf32>
    %49 = arith.divf %47, %48 : vector<2x96xf32>
    %50 = vector.extract_strided_slice %43 {offsets = [0, 96], sizes = [2, 32], strides = [1, 1]} : vector<2x128xf32> to vector<2x32xf32>
    %51 = math.tanh %50 : vector<2x32xf32>
    %52 = vector.extract_strided_slice %49 {offsets = [0, 0], sizes = [2, 32], strides = [1, 1]} : vector<2x96xf32> to vector<2x32xf32>
    %53 = vector.extract_strided_slice %49 {offsets = [0, 32], sizes = [2, 32], strides = [1, 1]} : vector<2x96xf32> to vector<2x32xf32>
    %54 = vector.extract_strided_slice %49 {offsets = [0, 64], sizes = [2, 32], strides = [1, 1]} : vector<2x96xf32> to vector<2x32xf32>
    %55 = arith.mulf %53, %34 : vector<2x32xf32>
    %56 = arith.mulf %52, %51 : vector<2x32xf32>
    %57 = arith.addf %55, %56 : vector<2x32xf32>
    %58 = math.tanh %57 : vector<2x32xf32>
    %59 = arith.mulf %54, %58 : vector<2x32xf32>
    %60 = vector.extract_strided_slice %39 {offsets = [0, 128], sizes = [2, 128], strides = [1, 1]} : vector<2x256xf32> to vector<2x128xf32>
    %c1 = arith.constant 1 : index
    %c0_16 = arith.constant 0 : index
    %61 = vector.load %arg3[%c1, %c0_16] : memref<2x128xf32, #tpu.memory_space<vmem>>, vector<1x128xf32>
    %62 = vector.broadcast %61 : vector<1x128xf32> to vector<2x128xf32>
    %63 = arith.addf %60, %62 : vector<2x128xf32>
    %64 = vector.extract_strided_slice %63 {offsets = [0, 0], sizes = [2, 96], strides = [1, 1]} : vector<2x128xf32> to vector<2x96xf32>
    %65 = arith.negf %64 : vector<2x96xf32>
    %66 = math.exp %65 : vector<2x96xf32>
    %cst_17 = arith.constant 1.000000e+00 : f32
    %67 = vector.broadcast %cst_17 : f32 to vector<2x96xf32>
    %68 = arith.addf %67, %66 : vector<2x96xf32>
    %69 = arith.divf %67, %68 : vector<2x96xf32>
    %70 = vector.extract_strided_slice %63 {offsets = [0, 96], sizes = [2, 32], strides = [1, 1]} : vector<2x128xf32> to vector<2x32xf32>
    %71 = math.tanh %70 : vector<2x32xf32>
    %72 = vector.extract_strided_slice %69 {offsets = [0, 0], sizes = [2, 32], strides = [1, 1]} : vector<2x96xf32> to vector<2x32xf32>
    %73 = vector.extract_strided_slice %69 {offsets = [0, 32], sizes = [2, 32], strides = [1, 1]} : vector<2x96xf32> to vector<2x32xf32>
    %74 = vector.extract_strided_slice %69 {offsets = [0, 64], sizes = [2, 32], strides = [1, 1]} : vector<2x96xf32> to vector<2x32xf32>
    %75 = arith.mulf %73, %13 : vector<2x32xf32>
    %76 = arith.mulf %72, %71 : vector<2x32xf32>
    %77 = arith.addf %75, %76 : vector<2x32xf32>
    %78 = math.tanh %77 : vector<2x32xf32>
    %79 = arith.mulf %74, %78 : vector<2x32xf32>
    %80 = tpu.concatenate %59, %79 in 1 : vector<2x32xf32>, vector<2x32xf32> -> vector<2x64xf32>
    %81 = arith.truncf %80 : vector<2x64xf32> to vector<2x64xbf16>
    %cst_18 = arith.constant dense<0.000000e+00> : vector<2x256xf32>
    %82 = tpu.matmul %81, %9, %cst_18 {dimension_numbers = #tpu.dot_dimension_numbers<[1], [0], [0], [1], [0, 0, 1, 1], [], []>} : vector<2x64xbf16>, vector<64x256xbf16>, vector<2x256xf32> -> vector<2x256xf32>
    %83 = vector.extract_strided_slice %82 {offsets = [0, 0], sizes = [2, 128], strides = [1, 1]} : vector<2x256xf32> to vector<2x128xf32>
    %84 = vector.extract_strided_slice %8 {offsets = [2, 0, 0], sizes = [1, 2, 128], strides = [1, 1, 1]} : vector<8x2x128xf32> to vector<1x2x128xf32>
    %85 = vector.shape_cast %84 : vector<1x2x128xf32> to vector<2x128xf32>
    %86 = arith.addf %83, %85 : vector<2x128xf32>
    %87 = vector.extract_strided_slice %86 {offsets = [0, 0], sizes = [2, 96], strides = [1, 1]} : vector<2x128xf32> to vector<2x96xf32>
    %88 = arith.negf %87 : vector<2x96xf32>
    %89 = math.exp %88 : vector<2x96xf32>
    %cst_19 = arith.constant 1.000000e+00 : f32
    %90 = vector.broadcast %cst_19 : f32 to vector<2x96xf32>
    %91 = arith.addf %90, %89 : vector<2x96xf32>
    %92 = arith.divf %90, %91 : vector<2x96xf32>
    %93 = vector.extract_strided_slice %86 {offsets = [0, 96], sizes = [2, 32], strides = [1, 1]} : vector<2x128xf32> to vector<2x32xf32>
    %94 = math.tanh %93 : vector<2x32xf32>
    %95 = vector.extract_strided_slice %92 {offsets = [0, 0], sizes = [2, 32], strides = [1, 1]} : vector<2x96xf32> to vector<2x32xf32>
    %96 = vector.extract_strided_slice %92 {offsets = [0, 32], sizes = [2, 32], strides = [1, 1]} : vector<2x96xf32> to vector<2x32xf32>
    %97 = vector.extract_strided_slice %92 {offsets = [0, 64], sizes = [2, 32], strides = [1, 1]} : vector<2x96xf32> to vector<2x32xf32>
    %98 = arith.mulf %96, %57 : vector<2x32xf32>
    %99 = arith.mulf %95, %94 : vector<2x32xf32>
    %100 = arith.addf %98, %99 : vector<2x32xf32>
    %101 = math.tanh %100 : vector<2x32xf32>
    %102 = arith.mulf %97, %101 : vector<2x32xf32>
    %103 = vector.extract_strided_slice %82 {offsets = [0, 128], sizes = [2, 128], strides = [1, 1]} : vector<2x256xf32> to vector<2x128xf32>
    %c1_20 = arith.constant 1 : index
    %c0_21 = arith.constant 0 : index
    %104 = vector.load %arg3[%c1_20, %c0_21] : memref<2x128xf32, #tpu.memory_space<vmem>>, vector<1x128xf32>
    %105 = vector.broadcast %104 : vector<1x128xf32> to vector<2x128xf32>
    %106 = arith.addf %103, %105 : vector<2x128xf32>
    %107 = vector.extract_strided_slice %106 {offsets = [0, 0], sizes = [2, 96], strides = [1, 1]} : vector<2x128xf32> to vector<2x96xf32>
    %108 = arith.negf %107 : vector<2x96xf32>
    %109 = math.exp %108 : vector<2x96xf32>
    %cst_22 = arith.constant 1.000000e+00 : f32
    %110 = vector.broadcast %cst_22 : f32 to vector<2x96xf32>
    %111 = arith.addf %110, %109 : vector<2x96xf32>
    %112 = arith.divf %110, %111 : vector<2x96xf32>
    %113 = vector.extract_strided_slice %106 {offsets = [0, 96], sizes = [2, 32], strides = [1, 1]} : vector<2x128xf32> to vector<2x32xf32>
    %114 = math.tanh %113 : vector<2x32xf32>
    %115 = vector.extract_strided_slice %112 {offsets = [0, 0], sizes = [2, 32], strides = [1, 1]} : vector<2x96xf32> to vector<2x32xf32>
    %116 = vector.extract_strided_slice %112 {offsets = [0, 32], sizes = [2, 32], strides = [1, 1]} : vector<2x96xf32> to vector<2x32xf32>
    %117 = vector.extract_strided_slice %112 {offsets = [0, 64], sizes = [2, 32], strides = [1, 1]} : vector<2x96xf32> to vector<2x32xf32>
    %118 = arith.mulf %116, %77 : vector<2x32xf32>
    %119 = arith.mulf %115, %114 : vector<2x32xf32>
    %120 = arith.addf %118, %119 : vector<2x32xf32>
    %121 = math.tanh %120 : vector<2x32xf32>
    %122 = arith.mulf %117, %121 : vector<2x32xf32>
    %123 = tpu.concatenate %102, %122 in 1 : vector<2x32xf32>, vector<2x32xf32> -> vector<2x64xf32>
    %124 = arith.truncf %123 : vector<2x64xf32> to vector<2x64xbf16>
    %cst_23 = arith.constant dense<0.000000e+00> : vector<2x256xf32>
    %125 = tpu.matmul %124, %9, %cst_23 {dimension_numbers = #tpu.dot_dimension_numbers<[1], [0], [0], [1], [0, 0, 1, 1], [], []>} : vector<2x64xbf16>, vector<64x256xbf16>, vector<2x256xf32> -> vector<2x256xf32>
    %126 = vector.extract_strided_slice %125 {offsets = [0, 0], sizes = [2, 128], strides = [1, 1]} : vector<2x256xf32> to vector<2x128xf32>
    %127 = vector.extract_strided_slice %8 {offsets = [3, 0, 0], sizes = [1, 2, 128], strides = [1, 1, 1]} : vector<8x2x128xf32> to vector<1x2x128xf32>
    %128 = vector.shape_cast %127 : vector<1x2x128xf32> to vector<2x128xf32>
    %129 = arith.addf %126, %128 : vector<2x128xf32>
    %130 = vector.extract_strided_slice %129 {offsets = [0, 0], sizes = [2, 96], strides = [1, 1]} : vector<2x128xf32> to vector<2x96xf32>
    %131 = arith.negf %130 : vector<2x96xf32>
    %132 = math.exp %131 : vector<2x96xf32>
    %cst_24 = arith.constant 1.000000e+00 : f32
    %133 = vector.broadcast %cst_24 : f32 to vector<2x96xf32>
    %134 = arith.addf %133, %132 : vector<2x96xf32>
    %135 = arith.divf %133, %134 : vector<2x96xf32>
    %136 = vector.extract_strided_slice %129 {offsets = [0, 96], sizes = [2, 32], strides = [1, 1]} : vector<2x128xf32> to vector<2x32xf32>
    %137 = math.tanh %136 : vector<2x32xf32>
    %138 = vector.extract_strided_slice %135 {offsets = [0, 0], sizes = [2, 32], strides = [1, 1]} : vector<2x96xf32> to vector<2x32xf32>
    %139 = vector.extract_strided_slice %135 {offsets = [0, 32], sizes = [2, 32], strides = [1, 1]} : vector<2x96xf32> to vector<2x32xf32>
    %140 = vector.extract_strided_slice %135 {offsets = [0, 64], sizes = [2, 32], strides = [1, 1]} : vector<2x96xf32> to vector<2x32xf32>
    %141 = arith.mulf %139, %100 : vector<2x32xf32>
    %142 = arith.mulf %138, %137 : vector<2x32xf32>
    %143 = arith.addf %141, %142 : vector<2x32xf32>
    %144 = math.tanh %143 : vector<2x32xf32>
    %145 = arith.mulf %140, %144 : vector<2x32xf32>
    %146 = vector.extract_strided_slice %125 {offsets = [0, 128], sizes = [2, 128], strides = [1, 1]} : vector<2x256xf32> to vector<2x128xf32>
    %c1_25 = arith.constant 1 : index
    %c0_26 = arith.constant 0 : index
    %147 = vector.load %arg3[%c1_25, %c0_26] : memref<2x128xf32, #tpu.memory_space<vmem>>, vector<1x128xf32>
    %148 = vector.broadcast %147 : vector<1x128xf32> to vector<2x128xf32>
    %149 = arith.addf %146, %148 : vector<2x128xf32>
    %150 = vector.extract_strided_slice %149 {offsets = [0, 0], sizes = [2, 96], strides = [1, 1]} : vector<2x128xf32> to vector<2x96xf32>
    %151 = arith.negf %150 : vector<2x96xf32>
    %152 = math.exp %151 : vector<2x96xf32>
    %cst_27 = arith.constant 1.000000e+00 : f32
    %153 = vector.broadcast %cst_27 : f32 to vector<2x96xf32>
    %154 = arith.addf %153, %152 : vector<2x96xf32>
    %155 = arith.divf %153, %154 : vector<2x96xf32>
    %156 = vector.extract_strided_slice %149 {offsets = [0, 96], sizes = [2, 32], strides = [1, 1]} : vector<2x128xf32> to vector<2x32xf32>
    %157 = math.tanh %156 : vector<2x32xf32>
    %158 = vector.extract_strided_slice %155 {offsets = [0, 0], sizes = [2, 32], strides = [1, 1]} : vector<2x96xf32> to vector<2x32xf32>
    %159 = vector.extract_strided_slice %155 {offsets = [0, 32], sizes = [2, 32], strides = [1, 1]} : vector<2x96xf32> to vector<2x32xf32>
    %160 = vector.extract_strided_slice %155 {offsets = [0, 64], sizes = [2, 32], strides = [1, 1]} : vector<2x96xf32> to vector<2x32xf32>
    %161 = arith.mulf %159, %120 : vector<2x32xf32>
    %162 = arith.mulf %158, %157 : vector<2x32xf32>
    %163 = arith.addf %161, %162 : vector<2x32xf32>
    %164 = math.tanh %163 : vector<2x32xf32>
    %165 = arith.mulf %160, %164 : vector<2x32xf32>
    %166 = tpu.concatenate %145, %165 in 1 : vector<2x32xf32>, vector<2x32xf32> -> vector<2x64xf32>
    %167 = arith.truncf %166 : vector<2x64xf32> to vector<2x64xbf16>
    %cst_28 = arith.constant dense<0.000000e+00> : vector<2x256xf32>
    %168 = tpu.matmul %167, %9, %cst_28 {dimension_numbers = #tpu.dot_dimension_numbers<[1], [0], [0], [1], [0, 0, 1, 1], [], []>} : vector<2x64xbf16>, vector<64x256xbf16>, vector<2x256xf32> -> vector<2x256xf32>
    %169 = vector.extract_strided_slice %168 {offsets = [0, 0], sizes = [2, 128], strides = [1, 1]} : vector<2x256xf32> to vector<2x128xf32>
    %170 = vector.extract_strided_slice %8 {offsets = [4, 0, 0], sizes = [1, 2, 128], strides = [1, 1, 1]} : vector<8x2x128xf32> to vector<1x2x128xf32>
    %171 = vector.shape_cast %170 : vector<1x2x128xf32> to vector<2x128xf32>
    %172 = arith.addf %169, %171 : vector<2x128xf32>
    %173 = vector.extract_strided_slice %172 {offsets = [0, 0], sizes = [2, 96], strides = [1, 1]} : vector<2x128xf32> to vector<2x96xf32>
    %174 = arith.negf %173 : vector<2x96xf32>
    %175 = math.exp %174 : vector<2x96xf32>
    %cst_29 = arith.constant 1.000000e+00 : f32
    %176 = vector.broadcast %cst_29 : f32 to vector<2x96xf32>
    %177 = arith.addf %176, %175 : vector<2x96xf32>
    %178 = arith.divf %176, %177 : vector<2x96xf32>
    %179 = vector.extract_strided_slice %172 {offsets = [0, 96], sizes = [2, 32], strides = [1, 1]} : vector<2x128xf32> to vector<2x32xf32>
    %180 = math.tanh %179 : vector<2x32xf32>
    %181 = vector.extract_strided_slice %178 {offsets = [0, 0], sizes = [2, 32], strides = [1, 1]} : vector<2x96xf32> to vector<2x32xf32>
    %182 = vector.extract_strided_slice %178 {offsets = [0, 32], sizes = [2, 32], strides = [1, 1]} : vector<2x96xf32> to vector<2x32xf32>
    %183 = vector.extract_strided_slice %178 {offsets = [0, 64], sizes = [2, 32], strides = [1, 1]} : vector<2x96xf32> to vector<2x32xf32>
    %184 = arith.mulf %182, %143 : vector<2x32xf32>
    %185 = arith.mulf %181, %180 : vector<2x32xf32>
    %186 = arith.addf %184, %185 : vector<2x32xf32>
    %187 = math.tanh %186 : vector<2x32xf32>
    %188 = arith.mulf %183, %187 : vector<2x32xf32>
    %189 = vector.extract_strided_slice %168 {offsets = [0, 128], sizes = [2, 128], strides = [1, 1]} : vector<2x256xf32> to vector<2x128xf32>
    %c1_30 = arith.constant 1 : index
    %c0_31 = arith.constant 0 : index
    %190 = vector.load %arg3[%c1_30, %c0_31] : memref<2x128xf32, #tpu.memory_space<vmem>>, vector<1x128xf32>
    %191 = vector.broadcast %190 : vector<1x128xf32> to vector<2x128xf32>
    %192 = arith.addf %189, %191 : vector<2x128xf32>
    %193 = vector.extract_strided_slice %192 {offsets = [0, 0], sizes = [2, 96], strides = [1, 1]} : vector<2x128xf32> to vector<2x96xf32>
    %194 = arith.negf %193 : vector<2x96xf32>
    %195 = math.exp %194 : vector<2x96xf32>
    %cst_32 = arith.constant 1.000000e+00 : f32
    %196 = vector.broadcast %cst_32 : f32 to vector<2x96xf32>
    %197 = arith.addf %196, %195 : vector<2x96xf32>
    %198 = arith.divf %196, %197 : vector<2x96xf32>
    %199 = vector.extract_strided_slice %192 {offsets = [0, 96], sizes = [2, 32], strides = [1, 1]} : vector<2x128xf32> to vector<2x32xf32>
    %200 = math.tanh %199 : vector<2x32xf32>
    %201 = vector.extract_strided_slice %198 {offsets = [0, 0], sizes = [2, 32], strides = [1, 1]} : vector<2x96xf32> to vector<2x32xf32>
    %202 = vector.extract_strided_slice %198 {offsets = [0, 32], sizes = [2, 32], strides = [1, 1]} : vector<2x96xf32> to vector<2x32xf32>
    %203 = vector.extract_strided_slice %198 {offsets = [0, 64], sizes = [2, 32], strides = [1, 1]} : vector<2x96xf32> to vector<2x32xf32>
    %204 = arith.mulf %202, %163 : vector<2x32xf32>
    %205 = arith.mulf %201, %200 : vector<2x32xf32>
    %206 = arith.addf %204, %205 : vector<2x32xf32>
    %207 = math.tanh %206 : vector<2x32xf32>
    %208 = arith.mulf %203, %207 : vector<2x32xf32>
    %209 = tpu.concatenate %188, %208 in 1 : vector<2x32xf32>, vector<2x32xf32> -> vector<2x64xf32>
    %210 = arith.truncf %209 : vector<2x64xf32> to vector<2x64xbf16>
    %cst_33 = arith.constant dense<0.000000e+00> : vector<2x256xf32>
    %211 = tpu.matmul %210, %9, %cst_33 {dimension_numbers = #tpu.dot_dimension_numbers<[1], [0], [0], [1], [0, 0, 1, 1], [], []>} : vector<2x64xbf16>, vector<64x256xbf16>, vector<2x256xf32> -> vector<2x256xf32>
    %212 = vector.extract_strided_slice %211 {offsets = [0, 0], sizes = [2, 128], strides = [1, 1]} : vector<2x256xf32> to vector<2x128xf32>
    %213 = vector.extract_strided_slice %8 {offsets = [5, 0, 0], sizes = [1, 2, 128], strides = [1, 1, 1]} : vector<8x2x128xf32> to vector<1x2x128xf32>
    %214 = vector.shape_cast %213 : vector<1x2x128xf32> to vector<2x128xf32>
    %215 = arith.addf %212, %214 : vector<2x128xf32>
    %216 = vector.extract_strided_slice %215 {offsets = [0, 0], sizes = [2, 96], strides = [1, 1]} : vector<2x128xf32> to vector<2x96xf32>
    %217 = arith.negf %216 : vector<2x96xf32>
    %218 = math.exp %217 : vector<2x96xf32>
    %cst_34 = arith.constant 1.000000e+00 : f32
    %219 = vector.broadcast %cst_34 : f32 to vector<2x96xf32>
    %220 = arith.addf %219, %218 : vector<2x96xf32>
    %221 = arith.divf %219, %220 : vector<2x96xf32>
    %222 = vector.extract_strided_slice %215 {offsets = [0, 96], sizes = [2, 32], strides = [1, 1]} : vector<2x128xf32> to vector<2x32xf32>
    %223 = math.tanh %222 : vector<2x32xf32>
    %224 = vector.extract_strided_slice %221 {offsets = [0, 0], sizes = [2, 32], strides = [1, 1]} : vector<2x96xf32> to vector<2x32xf32>
    %225 = vector.extract_strided_slice %221 {offsets = [0, 32], sizes = [2, 32], strides = [1, 1]} : vector<2x96xf32> to vector<2x32xf32>
    %226 = vector.extract_strided_slice %221 {offsets = [0, 64], sizes = [2, 32], strides = [1, 1]} : vector<2x96xf32> to vector<2x32xf32>
    %227 = arith.mulf %225, %186 : vector<2x32xf32>
    %228 = arith.mulf %224, %223 : vector<2x32xf32>
    %229 = arith.addf %227, %228 : vector<2x32xf32>
    %230 = math.tanh %229 : vector<2x32xf32>
    %231 = arith.mulf %226, %230 : vector<2x32xf32>
    %232 = vector.extract_strided_slice %211 {offsets = [0, 128], sizes = [2, 128], strides = [1, 1]} : vector<2x256xf32> to vector<2x128xf32>
    %c1_35 = arith.constant 1 : index
    %c0_36 = arith.constant 0 : index
    %233 = vector.load %arg3[%c1_35, %c0_36] : memref<2x128xf32, #tpu.memory_space<vmem>>, vector<1x128xf32>
    %234 = vector.broadcast %233 : vector<1x128xf32> to vector<2x128xf32>
    %235 = arith.addf %232, %234 : vector<2x128xf32>
    %236 = vector.extract_strided_slice %235 {offsets = [0, 0], sizes = [2, 96], strides = [1, 1]} : vector<2x128xf32> to vector<2x96xf32>
    %237 = arith.negf %236 : vector<2x96xf32>
    %238 = math.exp %237 : vector<2x96xf32>
    %cst_37 = arith.constant 1.000000e+00 : f32
    %239 = vector.broadcast %cst_37 : f32 to vector<2x96xf32>
    %240 = arith.addf %239, %238 : vector<2x96xf32>
    %241 = arith.divf %239, %240 : vector<2x96xf32>
    %242 = vector.extract_strided_slice %235 {offsets = [0, 96], sizes = [2, 32], strides = [1, 1]} : vector<2x128xf32> to vector<2x32xf32>
    %243 = math.tanh %242 : vector<2x32xf32>
    %244 = vector.extract_strided_slice %241 {offsets = [0, 0], sizes = [2, 32], strides = [1, 1]} : vector<2x96xf32> to vector<2x32xf32>
    %245 = vector.extract_strided_slice %241 {offsets = [0, 32], sizes = [2, 32], strides = [1, 1]} : vector<2x96xf32> to vector<2x32xf32>
    %246 = vector.extract_strided_slice %241 {offsets = [0, 64], sizes = [2, 32], strides = [1, 1]} : vector<2x96xf32> to vector<2x32xf32>
    %247 = arith.mulf %245, %206 : vector<2x32xf32>
    %248 = arith.mulf %244, %243 : vector<2x32xf32>
    %249 = arith.addf %247, %248 : vector<2x32xf32>
    %250 = math.tanh %249 : vector<2x32xf32>
    %251 = arith.mulf %246, %250 : vector<2x32xf32>
    %252 = tpu.concatenate %231, %251 in 1 : vector<2x32xf32>, vector<2x32xf32> -> vector<2x64xf32>
    %253 = arith.truncf %252 : vector<2x64xf32> to vector<2x64xbf16>
    %cst_38 = arith.constant dense<0.000000e+00> : vector<2x256xf32>
    %254 = tpu.matmul %253, %9, %cst_38 {dimension_numbers = #tpu.dot_dimension_numbers<[1], [0], [0], [1], [0, 0, 1, 1], [], []>} : vector<2x64xbf16>, vector<64x256xbf16>, vector<2x256xf32> -> vector<2x256xf32>
    %255 = vector.extract_strided_slice %254 {offsets = [0, 0], sizes = [2, 128], strides = [1, 1]} : vector<2x256xf32> to vector<2x128xf32>
    %256 = vector.extract_strided_slice %8 {offsets = [6, 0, 0], sizes = [1, 2, 128], strides = [1, 1, 1]} : vector<8x2x128xf32> to vector<1x2x128xf32>
    %257 = vector.shape_cast %256 : vector<1x2x128xf32> to vector<2x128xf32>
    %258 = arith.addf %255, %257 : vector<2x128xf32>
    %259 = vector.extract_strided_slice %258 {offsets = [0, 0], sizes = [2, 96], strides = [1, 1]} : vector<2x128xf32> to vector<2x96xf32>
    %260 = arith.negf %259 : vector<2x96xf32>
    %261 = math.exp %260 : vector<2x96xf32>
    %cst_39 = arith.constant 1.000000e+00 : f32
    %262 = vector.broadcast %cst_39 : f32 to vector<2x96xf32>
    %263 = arith.addf %262, %261 : vector<2x96xf32>
    %264 = arith.divf %262, %263 : vector<2x96xf32>
    %265 = vector.extract_strided_slice %258 {offsets = [0, 96], sizes = [2, 32], strides = [1, 1]} : vector<2x128xf32> to vector<2x32xf32>
    %266 = math.tanh %265 : vector<2x32xf32>
    %267 = vector.extract_strided_slice %264 {offsets = [0, 0], sizes = [2, 32], strides = [1, 1]} : vector<2x96xf32> to vector<2x32xf32>
    %268 = vector.extract_strided_slice %264 {offsets = [0, 32], sizes = [2, 32], strides = [1, 1]} : vector<2x96xf32> to vector<2x32xf32>
    %269 = vector.extract_strided_slice %264 {offsets = [0, 64], sizes = [2, 32], strides = [1, 1]} : vector<2x96xf32> to vector<2x32xf32>
    %270 = arith.mulf %268, %229 : vector<2x32xf32>
    %271 = arith.mulf %267, %266 : vector<2x32xf32>
    %272 = arith.addf %270, %271 : vector<2x32xf32>
    %273 = math.tanh %272 : vector<2x32xf32>
    %274 = arith.mulf %269, %273 : vector<2x32xf32>
    %275 = vector.extract_strided_slice %254 {offsets = [0, 128], sizes = [2, 128], strides = [1, 1]} : vector<2x256xf32> to vector<2x128xf32>
    %c1_40 = arith.constant 1 : index
    %c0_41 = arith.constant 0 : index
    %276 = vector.load %arg3[%c1_40, %c0_41] : memref<2x128xf32, #tpu.memory_space<vmem>>, vector<1x128xf32>
    %277 = vector.broadcast %276 : vector<1x128xf32> to vector<2x128xf32>
    %278 = arith.addf %275, %277 : vector<2x128xf32>
    %279 = vector.extract_strided_slice %278 {offsets = [0, 0], sizes = [2, 96], strides = [1, 1]} : vector<2x128xf32> to vector<2x96xf32>
    %280 = arith.negf %279 : vector<2x96xf32>
    %281 = math.exp %280 : vector<2x96xf32>
    %cst_42 = arith.constant 1.000000e+00 : f32
    %282 = vector.broadcast %cst_42 : f32 to vector<2x96xf32>
    %283 = arith.addf %282, %281 : vector<2x96xf32>
    %284 = arith.divf %282, %283 : vector<2x96xf32>
    %285 = vector.extract_strided_slice %278 {offsets = [0, 96], sizes = [2, 32], strides = [1, 1]} : vector<2x128xf32> to vector<2x32xf32>
    %286 = math.tanh %285 : vector<2x32xf32>
    %287 = vector.extract_strided_slice %284 {offsets = [0, 0], sizes = [2, 32], strides = [1, 1]} : vector<2x96xf32> to vector<2x32xf32>
    %288 = vector.extract_strided_slice %284 {offsets = [0, 32], sizes = [2, 32], strides = [1, 1]} : vector<2x96xf32> to vector<2x32xf32>
    %289 = vector.extract_strided_slice %284 {offsets = [0, 64], sizes = [2, 32], strides = [1, 1]} : vector<2x96xf32> to vector<2x32xf32>
    %290 = arith.mulf %288, %249 : vector<2x32xf32>
    %291 = arith.mulf %287, %286 : vector<2x32xf32>
    %292 = arith.addf %290, %291 : vector<2x32xf32>
    %293 = math.tanh %292 : vector<2x32xf32>
    %294 = arith.mulf %289, %293 : vector<2x32xf32>
    %295 = tpu.concatenate %274, %294 in 1 : vector<2x32xf32>, vector<2x32xf32> -> vector<2x64xf32>
    %296 = arith.truncf %295 : vector<2x64xf32> to vector<2x64xbf16>
    %cst_43 = arith.constant dense<0.000000e+00> : vector<2x256xf32>
    %297 = tpu.matmul %296, %9, %cst_43 {dimension_numbers = #tpu.dot_dimension_numbers<[1], [0], [0], [1], [0, 0, 1, 1], [], []>} : vector<2x64xbf16>, vector<64x256xbf16>, vector<2x256xf32> -> vector<2x256xf32>
    %298 = vector.extract_strided_slice %297 {offsets = [0, 0], sizes = [2, 128], strides = [1, 1]} : vector<2x256xf32> to vector<2x128xf32>
    %299 = vector.extract_strided_slice %8 {offsets = [7, 0, 0], sizes = [1, 2, 128], strides = [1, 1, 1]} : vector<8x2x128xf32> to vector<1x2x128xf32>
    %300 = vector.shape_cast %299 : vector<1x2x128xf32> to vector<2x128xf32>
    %301 = arith.addf %298, %300 : vector<2x128xf32>
    %302 = vector.extract_strided_slice %301 {offsets = [0, 0], sizes = [2, 96], strides = [1, 1]} : vector<2x128xf32> to vector<2x96xf32>
    %303 = arith.negf %302 : vector<2x96xf32>
    %304 = math.exp %303 : vector<2x96xf32>
    %cst_44 = arith.constant 1.000000e+00 : f32
    %305 = vector.broadcast %cst_44 : f32 to vector<2x96xf32>
    %306 = arith.addf %305, %304 : vector<2x96xf32>
    %307 = arith.divf %305, %306 : vector<2x96xf32>
    %308 = vector.extract_strided_slice %301 {offsets = [0, 96], sizes = [2, 32], strides = [1, 1]} : vector<2x128xf32> to vector<2x32xf32>
    %309 = math.tanh %308 : vector<2x32xf32>
    %310 = vector.extract_strided_slice %307 {offsets = [0, 0], sizes = [2, 32], strides = [1, 1]} : vector<2x96xf32> to vector<2x32xf32>
    %311 = vector.extract_strided_slice %307 {offsets = [0, 32], sizes = [2, 32], strides = [1, 1]} : vector<2x96xf32> to vector<2x32xf32>
    %312 = vector.extract_strided_slice %307 {offsets = [0, 64], sizes = [2, 32], strides = [1, 1]} : vector<2x96xf32> to vector<2x32xf32>
    %313 = arith.mulf %311, %272 : vector<2x32xf32>
    %314 = arith.mulf %310, %309 : vector<2x32xf32>
    %315 = arith.addf %313, %314 : vector<2x32xf32>
    %316 = math.tanh %315 : vector<2x32xf32>
    %317 = arith.mulf %312, %316 : vector<2x32xf32>
    %318 = vector.extract_strided_slice %297 {offsets = [0, 128], sizes = [2, 128], strides = [1, 1]} : vector<2x256xf32> to vector<2x128xf32>
    %c1_45 = arith.constant 1 : index
    %c0_46 = arith.constant 0 : index
    %319 = vector.load %arg3[%c1_45, %c0_46] : memref<2x128xf32, #tpu.memory_space<vmem>>, vector<1x128xf32>
    %320 = vector.broadcast %319 : vector<1x128xf32> to vector<2x128xf32>
    %321 = arith.addf %318, %320 : vector<2x128xf32>
    %322 = vector.extract_strided_slice %321 {offsets = [0, 0], sizes = [2, 96], strides = [1, 1]} : vector<2x128xf32> to vector<2x96xf32>
    %323 = arith.negf %322 : vector<2x96xf32>
    %324 = math.exp %323 : vector<2x96xf32>
    %cst_47 = arith.constant 1.000000e+00 : f32
    %325 = vector.broadcast %cst_47 : f32 to vector<2x96xf32>
    %326 = arith.addf %325, %324 : vector<2x96xf32>
    %327 = arith.divf %325, %326 : vector<2x96xf32>
    %328 = vector.extract_strided_slice %321 {offsets = [0, 96], sizes = [2, 32], strides = [1, 1]} : vector<2x128xf32> to vector<2x32xf32>
    %329 = math.tanh %328 : vector<2x32xf32>
    %330 = vector.extract_strided_slice %327 {offsets = [0, 0], sizes = [2, 32], strides = [1, 1]} : vector<2x96xf32> to vector<2x32xf32>
    %331 = vector.extract_strided_slice %327 {offsets = [0, 32], sizes = [2, 32], strides = [1, 1]} : vector<2x96xf32> to vector<2x32xf32>
    %332 = vector.extract_strided_slice %327 {offsets = [0, 64], sizes = [2, 32], strides = [1, 1]} : vector<2x96xf32> to vector<2x32xf32>
    %333 = arith.mulf %331, %292 : vector<2x32xf32>
    %334 = arith.mulf %330, %329 : vector<2x32xf32>
    %335 = arith.addf %333, %334 : vector<2x32xf32>
    %336 = math.tanh %335 : vector<2x32xf32>
    %337 = arith.mulf %332, %336 : vector<2x32xf32>
    %338 = tpu.concatenate %317, %337 in 1 : vector<2x32xf32>, vector<2x32xf32> -> vector<2x64xf32>
    %339 = arith.truncf %338 : vector<2x64xf32> to vector<2x64xbf16>
    %cst_48 = arith.constant dense<0.000000e+00> : vector<2x256xf32>
    %340 = tpu.matmul %339, %9, %cst_48 {dimension_numbers = #tpu.dot_dimension_numbers<[1], [0], [0], [1], [0, 0, 1, 1], [], []>} : vector<2x64xbf16>, vector<64x256xbf16>, vector<2x256xf32> -> vector<2x256xf32>
    %341 = vector.extract_strided_slice %340 {offsets = [0, 128], sizes = [2, 128], strides = [1, 1]} : vector<2x256xf32> to vector<2x128xf32>
    %c1_49 = arith.constant 1 : index
    %c0_50 = arith.constant 0 : index
    %342 = vector.load %arg3[%c1_49, %c0_50] : memref<2x128xf32, #tpu.memory_space<vmem>>, vector<1x128xf32>
    %343 = vector.broadcast %342 : vector<1x128xf32> to vector<2x128xf32>
    %344 = arith.addf %341, %343 : vector<2x128xf32>
    %345 = vector.extract_strided_slice %344 {offsets = [0, 0], sizes = [2, 96], strides = [1, 1]} : vector<2x128xf32> to vector<2x96xf32>
    %346 = arith.negf %345 : vector<2x96xf32>
    %347 = math.exp %346 : vector<2x96xf32>
    %cst_51 = arith.constant 1.000000e+00 : f32
    %348 = vector.broadcast %cst_51 : f32 to vector<2x96xf32>
    %349 = arith.addf %348, %347 : vector<2x96xf32>
    %350 = arith.divf %348, %349 : vector<2x96xf32>
    %351 = vector.extract_strided_slice %344 {offsets = [0, 96], sizes = [2, 32], strides = [1, 1]} : vector<2x128xf32> to vector<2x32xf32>
    %352 = math.tanh %351 : vector<2x32xf32>
    %353 = vector.extract_strided_slice %350 {offsets = [0, 0], sizes = [2, 32], strides = [1, 1]} : vector<2x96xf32> to vector<2x32xf32>
    %354 = vector.extract_strided_slice %350 {offsets = [0, 32], sizes = [2, 32], strides = [1, 1]} : vector<2x96xf32> to vector<2x32xf32>
    %355 = vector.extract_strided_slice %350 {offsets = [0, 64], sizes = [2, 32], strides = [1, 1]} : vector<2x96xf32> to vector<2x32xf32>
    %356 = arith.mulf %354, %335 : vector<2x32xf32>
    %357 = arith.mulf %353, %352 : vector<2x32xf32>
    %358 = arith.addf %356, %357 : vector<2x32xf32>
    %359 = math.tanh %358 : vector<2x32xf32>
    %360 = arith.mulf %355, %359 : vector<2x32xf32>
    %cst_52 = arith.constant dense<0.000000e+00> : vector<2x16xf32>
    %361 = vector.multi_reduction <add>, %0, %cst_52 [0] : vector<8x2x16xf32> to vector<2x16xf32>
    %cst_53 = arith.constant 8.000000e+00 : f32
    %362 = vector.broadcast %cst_53 : f32 to vector<2x16xf32>
    %363 = arith.divf %361, %362 : vector<2x16xf32>
    %364 = vector.shape_cast %363 : vector<2x16xf32> to vector<1x2x16xf32>
    %365 = vector.broadcast %364 : vector<1x2x16xf32> to vector<8x2x16xf32>
    %366 = arith.subf %0, %365 : vector<8x2x16xf32>
    %cst_54 = arith.constant 9.99999971E-10 : f32
    %367 = vector.broadcast %cst_54 : f32 to vector<8x2x16xf32>
    %368 = arith.addf %366, %367 : vector<8x2x16xf32>
    %369 = arith.mulf %368, %368 : vector<8x2x16xf32>
    %cst_55 = arith.constant dense<0.000000e+00> : vector<2x16xf32>
    %370 = vector.multi_reduction <add>, %369, %cst_55 [0] : vector<8x2x16xf32> to vector<2x16xf32>
    %371 = math.sqrt %370 : vector<2x16xf32>
    %c0_56 = arith.constant 0 : index
    %c0_57 = arith.constant 0 : index
    %372 = vector.load %arg4[%c0_56, %c0_57] : memref<16x32xf32, #tpu.memory_space<vmem>>, vector<16x32xf32>
    %cst_58 = arith.constant dense<0.000000e+00> : vector<2x32xf32>
    %373 = tpu.matmul %363, %372, %cst_58 {dimension_numbers = #tpu.dot_dimension_numbers<[1], [0], [0], [1], [0, 0, 1, 1], [], []>} : vector<2x16xf32>, vector<16x32xf32>, vector<2x32xf32> -> vector<2x32xf32>
    %c0_59 = arith.constant 0 : index
    %c0_60 = arith.constant 0 : index
    %374 = vector.load %arg5[%c0_59, %c0_60] : memref<16x32xf32, #tpu.memory_space<vmem>>, vector<16x32xf32>
    %cst_61 = arith.constant dense<0.000000e+00> : vector<2x32xf32>
    %375 = tpu.matmul %371, %374, %cst_61 {dimension_numbers = #tpu.dot_dimension_numbers<[1], [0], [0], [1], [0, 0, 1, 1], [], []>} : vector<2x16xf32>, vector<16x32xf32>, vector<2x32xf32> -> vector<2x32xf32>
    %376 = arith.addf %373, %375 : vector<2x32xf32>
    %c0_62 = arith.constant 0 : index
    %c0_63 = arith.constant 0 : index
    %377 = vector.load %arg6[%c0_62, %c0_63] : memref<1x32xf32, #tpu.memory_space<vmem>>, vector<1x32xf32>
    %378 = vector.broadcast %377 : vector<1x32xf32> to vector<2x32xf32>
    %379 = arith.addf %376, %378 : vector<2x32xf32>
    %cst_64 = arith.constant 0.000000e+00 : f32
    %380 = vector.broadcast %cst_64 : f32 to vector<2x32xf32>
    %381 = arith.maximumf %379, %380 : vector<2x32xf32>
    %382 = arith.addf %381, %360 : vector<2x32xf32>
    %c0_65 = arith.constant 0 : index
    %c0_66 = arith.constant 0 : index
    %383 = vector.load %arg7[%c0_65, %c0_66] : memref<32x4xf32, #tpu.memory_space<vmem>>, vector<32x4xf32>
    %cst_67 = arith.constant dense<0.000000e+00> : vector<2x4xf32>
    %384 = tpu.matmul %382, %383, %cst_67 {dimension_numbers = #tpu.dot_dimension_numbers<[1], [0], [0], [1], [0, 0, 1, 1], [], []>} : vector<2x32xf32>, vector<32x4xf32>, vector<2x4xf32> -> vector<2x4xf32>
    %c0_68 = arith.constant 0 : index
    %c0_69 = arith.constant 0 : index
    %385 = vector.load %arg8[%c0_68, %c0_69] : memref<1x4xf32, #tpu.memory_space<vmem>>, vector<1x4xf32>
    %386 = vector.broadcast %385 : vector<1x4xf32> to vector<2x4xf32>
    %387 = arith.addf %384, %386 : vector<2x4xf32>
    %c0_70 = arith.constant 0 : index
    %c0_71 = arith.constant 0 : index
    %388 = vector.load %arg9[%c0_70, %c0_71] : memref<2x4xf32, #tpu.memory_space<vmem>>, vector<2x4xf32>
    tpu.vector_store %arg9[%c0_70, %c0_71], %387 {strides = array<i32>} : memref<2x4xf32, #tpu.memory_space<vmem>>, vector<2x4xf32>,
    return
  }
}

</mosaic_0001>

<bundles_post_ra>
// kernel: tpu_custom_call.1
= control target key start
LH: loop header
LB: loop body
LE: loop exit
PB: predicated region body
PF: predicated region fallthrough
CT: control target
= control target key end

     0   :  { %14 = vsyncpa [#allocation3], 0  ;;  %s2265_s0 = inlined_call_operand.vmem [shape: f32[8,2,16], index: 0, kind: input, shape index: {}]   ;;  %s2266_s1 = inlined_call_operand.hbm [shape: bf16[16,128], index: 1, kind: input, shape index: {}]   ;;  %s2267_s2 = inlined_call_operand.hbm [shape: bf16[64,256], index: 2, kind: input, shape index: {}]   ;;  %s2268_s3 = inlined_call_operand.vmem [shape: f32[2,128], index: 3, kind: input, shape index: {}]   ;;  %s2269_s4 = inlined_call_operand.vmem [shape: f32[16,32], index: 4, kind: input, shape index: {}]   ;;  %s2270_s5 = inlined_call_operand.hbm [shape: f32[16,32], index: 5, kind: input, shape index: {}]   ;;  %s2271_s6 = inlined_call_operand.vmem [shape: f32[1,32], index: 6, kind: input, shape index: {}]   ;;  %s2272_s7 = inlined_call_operand.vmem [shape: f32[32,4], index: 7, kind: input, shape index: {}]   ;;  %s2273_s8 = inlined_call_operand.vmem [shape: f32[1,4], index: 8, kind: input, shape index: {}]   ;;  %s2274_s9 = inlined_call_operand.hbm [shape: f32[2,4], index: 9, kind: output, shape index: {}]  }
   0x1   :  { %15 = vsyncpa [#allocation6], 0 }
   0x2   :  { %16 = vsyncpa [#allocation4], 0  ;;  %s1815_s30 = smov [#allocation5]  }
   0x3   :  { %s36_s10 = sshll.u32 %s1815_s30, 4  ;;  %s37_s10 = int_to_ptr.vmem [resolvable:$true] %s36_s10 }
   0x4   :  { %s1737_s11 = scalar_lea.vmem %s37_s10, 1024  ;;  %p1742_p1 = scmp.lt.s32.totalorder %s37_s10, %s37_s10 }
   0x5   :  { %p1738_p0 = scmp.ne.s32.totalorder %s37_s10, %s1737_s11  ;;  %p1743_p2 = scmp.lt.s32.totalorder %s1737_s11, %s1737_s11 }
   0x7   :  { %p1744_p3 = por %p1743_p2, %p1742_p1 }
   0x9   :  { %p1745_p4 = pnand %p1744_p3, %p1738_p0 }
   0xb   :  { %1748 = shalt.err (!%p1745_p4)
}
   0xc   :  { %s1816_s12 = smov 128   ;;  %s1817_s13 = smov 8  }
   0xd   :  { %42 = dma.hbm_to_vmem [thread:$0]  %s2267_s2, 1024, %s37_s10, [#allocation6], %s1816_s12, %s1816_s12, %s1817_s13  }
   0xe   :  { %s1818_s16 = smov [#allocation2]  }
   0xf   :  { %s24_s17 = sshll.u32 %s1818_s16, 4  ;;  %s25_s17 = int_to_ptr.vmem [resolvable:$true] %s24_s17 }
  0x10   :  { %s1757_s18 = scalar_lea.vmem %s25_s17, 128  ;;  %p1762_p6 = scmp.lt.s32.totalorder %s25_s17, %s25_s17 }
  0x11   :  { %p1758_p5 = scmp.ne.s32.totalorder %s25_s17, %s1757_s18  ;;  %p1763_p7 = scmp.lt.s32.totalorder %s1757_s18, %s1757_s18 }
  0x13   :  { %p1764_p8 = por %p1763_p7, %p1762_p6 }
  0x15   :  { %p1765_p9 = pnand %p1764_p8, %p1758_p5 }
  0x17   :  { %1768 = shalt.err (!%p1765_p9)
}
  0x18   :  { %s1819_s19 = smov 64   ;;  %s1820_s20 = smov 4  }
  0x19   :  { %30 = dma.hbm_to_vmem [thread:$0]  %s2266_s1, 128, %s25_s17, [#allocation3], %s1819_s19, %s1819_s19, %s1820_s20  }
  0x1a   :  { %s1821_s23 = smov [#allocation7]  }
  0x1b   :  { %s52_s2 = sshll.u32 %s1821_s23, 4  ;;  %s53_s2 = int_to_ptr.vmem [resolvable:$true] %s52_s2 }
  0x1c   :  { %s1777_s24 = scalar_lea.vmem %s53_s2, 256  ;;  %p1782_p11 = scmp.lt.s32.totalorder %s53_s2, %s53_s2 }
  0x1d   :  { %p1778_p10 = scmp.ne.s32.totalorder %s53_s2, %s1777_s24  ;;  %p1783_p12 = scmp.lt.s32.totalorder %s1777_s24, %s1777_s24 }
  0x1f   :  { %p1784_p13 = por %p1783_p12, %p1782_p11 }
  0x21   :  { %p1785_p0 = pnand %p1784_p13, %p1778_p10 }
  0x23   :  { %1788 = shalt.err (!%p1785_p0)
}
  0x24   :  { %58 = dma.hbm_to_vmem [thread:$0]  %s2270_s5, 256, %s53_s2, [#allocation6], %s1816_s12, %s1816_s12, %s1817_s13  }
  0x25   :  { %1809 = dma.done.wait [#allocation3], 128  }
  0x26   :  { %1810 = vsyncadd [#allocation3], 4294967168 }
  0x27   :  { %1811 = dma.done.wait [#allocation6], 1280  }
  0x28   :  { %1812 = vsyncadd [#allocation6], 4294966016  ;;  %v1822_v0 = vmov 0.0   ;;  %vm1823_vm0 = vmmov 0   ;;  %v1824_v1 = vmov 1983009808   ;;  %v96_v3 = vlaneseq }
  0x29   :  { %1540 = vmatprep.subr.bf16.mxu0 %v1822_v0  ;;  %1542 = vmatprep.mubr.msk.bf16.mxu0 %vm1823_vm0, %v1822_v0  ;;  %v94_v2 = vunpack.c.l.s4 %v1824_v1  ;;  %v1825_v4 = vmov 0   ;;  %v1895_v7 = vld [vmem:[#allocation5 + $0x34] ss:$8 sps:$4 sm:$0xff]   ;;  %v1897_v8 = vld [vmem:[#allocation5 + $0x30] ss:$8 sps:$4 sm:$0xff]   ;;  %vm1156_vm1 = vcmask 123904  }
  0x2a   :  { %315 = vmatprep.mubr.bf16.mxu1 %v1825_v4  ;;  %v97_v6 = vshrl.u32 %v96_v3, 7  ;;  %291 = vmatprep.subr.bf16.mxu1 %v1895_v7  ;;  %v1589_v9 = vld [vmem:[#allocation2] sm:$0xff]   ;;  %v1901_v10 = vld [vmem:[#allocation5 + $0x24] ss:$8 sps:$4 sm:$0xff]   ;;  %v1903_v11 = vld [vmem:[#allocation5 + $0x20] ss:$8 sps:$4 sm:$0xff]  }
  0x2b   :  { %v95_v5 = vunpack.c.0.s8 %v94_v2  ;;  %292 = vmatpush1.bf16.msra.mxu1 %v1897_v8  ;;  %v1908_v12 = vld [vmem:[%s2265_s0] sm:$0x3]  ;;  %1541 = vmatpush3.bf16.msra.mxu0 %v1589_v9  ;;  %v1915_v14 = vld [vmem:[%s2265_s0 + $0x2] sm:$0x3]  ;;  %v1920_v15 = vld [vmem:[%s2265_s0 + $0x4] sm:$0x3] }
  0x2c   :  { %v1925_v16 = vld [vmem:[%s2265_s0 + $0x6] sm:$0x3]  ;;  %293 = vmatprep.subr.bf16.mxu1 %v1901_v10  ;;  %v1931_v17 = vld [vmem:[%s2265_s0 + $0x8] sm:$0x3]  ;;  %v1936_v18 = vld [vmem:[%s2265_s0 + $0xa] sm:$0x3]  ;;  %v91_v20 = vcombine.low %v1908_v12, %v1915_v14  ;;  %366 = vmatprep.subr.bf16.mxu0 %v1895_v7 }
  0x2d   :  { %v1910_v13 = vsub.s32 %v95_v5, %v97_v6  ;;  %v1941_v19 = vld [vmem:[%s2265_s0 + $0xc] sm:$0x3]  ;;  %v92_v21 = vcombine.low %v1920_v15, %v1925_v16  ;;  %v1951_v22 = vld [vmem:[%s2265_s0 + $0xe] sm:$0x3]  ;;  %v108_v23 = vcombine.low %v1931_v17, %v1936_v18  ;;  %v1157_v24 = vsel %vm1156_vm1, %v1908_v12, 0.0  ;;  %s1827_s22 = smov 32  }
  0x2e   :  { %v1158_v25 = vsel %vm1156_vm1, %v1915_v14, 0.0  ;;  %v1160_v26 = vsel %vm1156_vm1, %v1920_v15, 0.0  ;;  %v109_v29 = vcombine.low %v1941_v19, %v1951_v22  ;;  %v1966_v31 = vld [vmem:[#allocation5 + $0x14] ss:$8 sps:$4 sm:$0xff]   ;;  %v1968_v32 = vld [vmem:[#allocation5 + $0x10] ss:$8 sps:$4 sm:$0xff]  }
  0x2f   :  { %294 = vmatpush1.bf16.msra.mxu1 %v1903_v11  ;;  %v99_v27 = vrot.slane %v91_v20, %v1910_v13  ;;  %v106_v28 = vrot.slane %v92_v21, %v1910_v13  ;;  %v1159_v30 = vadd.f32 %v1158_v25, %v1157_v24  ;;  %v116_v33 = vrot.slane %v108_v23, %v1910_v13  ;;  %v1975_v38 = vld [vmem:[#allocation5 + $0x4] ss:$8 sps:$4 sm:$0xff]   ;;  %v1980_v42 = vld [vmem:[#allocation5] ss:$8 sps:$4 sm:$0xff]  }
  0x30   :  { %v1162_v34 = vsel %vm1156_vm1, %v1925_v16, 0.0  ;;  %v123_v36 = vrot.slane %v109_v29, %v1910_v13  ;;  %295 = vmatprep.subr.bf16.mxu1 %v1966_v31  ;;  %v1164_v39 = vsel %vm1156_vm1, %v1931_v17, 0.0  ;;  %vm141_vm2 = vcmask 130048  }
  0x31   :  { %v107_v35 = vcombine.low %v99_v27, %v106_v28  ;;  %v1161_v37 = vadd.f32 %v1160_v26, %v1159_v30  ;;  %v1166_v43 = vsel %vm1156_vm1, %v1936_v18, 0.0  ;;  %v1168_v46 = vsel %vm1156_vm1, %v1941_v19, 0.0 }
  0x32   :  { %v124_v40 = vcombine.low %v116_v33, %v123_v36  ;;  %v1170_v48 = vsel %vm1156_vm1, %v1951_v22, 0.0  ;;  %v1826_v50 = vmov 0.0|0.0   ;;  %vm352_vm3 = vcmask 261120  }
  0x33   :  { %v1163_v41 = vadd.f32 %v1162_v34, %v1161_v37  ;;  %296 = vmatpush1.bf16.msra.mxu1 %v1968_v32  ;;  %v1486_v37 = vld [vmem:[%s2268_s3] ss:$0 sm:$0xff]  ;;  %vm279_vm4 = vcmask 523264   ;;  %vm1468_vm7 = vcmask 25600  }
  0x34   :  { %297 = vmatprep.subr.bf16.mxu1 %v1975_v38  ;;  %v127_v44 = vpack.c.bf16 %v124_v40, %v107_v35 }
  0x35   :  { %v1165_v45 = vadd.f32 %v1164_v39, %v1163_v41 }
  0x36   :  { %1543 = vmatmul.mubr.msk.bf16.vlgmr.msra.gmra.mxu0 %vm141_vm2, %v127_v44 }
  0x37   :  { %v1167_v47 = vadd.f32 %v1166_v43, %v1165_v45  ;;  %298 = vmatpush1.bf16.msra.mxu1 %v1980_v42  ;;  %367 = vmatpush1.bf16.msra.mxu0 %v1897_v8 }
  0x38   :  { %390 = vmatprep.mubr.bf16.mxu0 %v1825_v4  ;;  %368 = vmatprep.subr.bf16.mxu0 %v1901_v10 }
  0x39   :  { %v1169_v49 = vadd.f32 %v1168_v46, %v1167_v47  ;;  %475 = vmatprep.subr.bf16.mxu1 %v1895_v7 }
  0x3a   :  { %316 = vmatmul.mubr.bf16.vlgmr.msra.gmra.mxu1 %v1826_v50 }
  0x3b   :  { %v1171_v51 = vadd.f32 %v1170_v48, %v1169_v49  ;;  %476 = vmatpush1.bf16.msra.mxu1 %v1897_v8  ;;  %499 = vmatprep.mubr.bf16.mxu1 %v1825_v4 }
  0x3c   :  { %369 = vmatpush1.bf16.msra.mxu0 %v1903_v11  ;;  %477 = vmatprep.subr.bf16.mxu1 %v1901_v10 }
  0x3d   :  { %v1999_v52 = vmul.f32 0.125, %v1171_v51  ;;  %370 = vmatprep.subr.bf16.mxu0 %v1966_v31 }
  0x3f   :  { %v1174_v53 = vsub.f32 %v1908_v12, %v1999_v52  ;;  %v1175_v54 = vsub.f32 %v1915_v14, %v1999_v52  ;;  %v1176_v55 = vsub.f32 %v1920_v15, %v1999_v52  ;;  %v1177_v56 = vsub.f32 %v1925_v16, %v1999_v52  ;;  %478 = vmatpush1.bf16.msra.mxu1 %v1903_v11 }
  0x40   :  { %v1178_v57 = vsub.f32 %v1931_v17, %v1999_v52  ;;  %v1179_v58 = vsub.f32 %v1936_v18, %v1999_v52  ;;  %v1180_v59 = vsub.f32 %v1941_v19, %v1999_v52  ;;  %v1181_v60 = vsub.f32 %v1951_v22, %v1999_v52  ;;  %371 = vmatpush1.bf16.msra.mxu0 %v1968_v32 }
  0x41   :  { %v1182_v61 = vadd.f32 1e-09, %v1174_v53  ;;  %v1183_v62 = vadd.f32 1e-09, %v1175_v54  ;;  %v1184_v63 = vadd.f32 1e-09, %v1176_v55  ;;  %372 = vmatprep.subr.bf16.mxu0 %v1975_v38  ;;  %479 = vmatprep.subr.bf16.mxu1 %v1966_v31 }
  0x42   :  { %v1185_v1 = vadd.f32 1e-09, %v1177_v56  ;;  %v1186_v2 = vadd.f32 1e-09, %v1178_v57  ;;  %v1187_v3 = vadd.f32 1e-09, %v1179_v58 }
  0x43   :  { %v1190_v5 = vmul.f32 %v1182_v61, %v1182_v61  ;;  %v1191_v6 = vmul.f32 %v1183_v62, %v1183_v62  ;;  %480 = vmatpush1.bf16.msra.mxu1 %v1968_v32  ;;  %v1192_v9 = vmul.f32 %v1184_v63, %v1184_v63  ;;  %v1188_v14 = vadd.f32 1e-09, %v1180_v59 }
  0x44   :  { %v1193_v12 = vmul.f32 %v1185_v1, %v1185_v1  ;;  %373 = vmatpush1.bf16.msra.mxu0 %v1980_v42  ;;  %v1194_v15 = vmul.f32 %v1186_v2, %v1186_v2  ;;  %481 = vmatprep.subr.bf16.mxu1 %v1975_v38  ;;  %v1189_v20 = vadd.f32 1e-09, %v1181_v60  ;;  %v1195_v21 = vmul.f32 %v1187_v3, %v1187_v3 }
  0x45   :  { %v1198_v16 = vsel %vm1156_vm1, %v1190_v5, 0.0  ;;  %v1199_v17 = vsel %vm1156_vm1, %v1191_v6, 0.0  ;;  %579 = vmatprep.subr.bf16.mxu0 %v1895_v7  ;;  %v1201_v19 = vsel %vm1156_vm1, %v1192_v9, 0.0  ;;  %v1196_v24 = vmul.f32 %v1188_v14, %v1188_v14  ;;  %v2065_v14 = vld [vmem:[%s2268_s3 + $0x1] ss:$0 sm:$0xff]  ;;  %s1828_s3 = smov 96  }
  0x46   :  { %v1200_v18 = vadd.f32 %v1199_v17, %v1198_v16  ;;  %v1203_v22 = vsel %vm1156_vm1, %v1193_v12, 0.0  ;;  %v1205_v25 = vsel %vm1156_vm1, %v1194_v15, 0.0  ;;  %v1197_v27 = vmul.f32 %v1189_v20, %v1189_v20 }
  0x47   :  { %482 = vmatpush1.bf16.msra.mxu1 %v1980_v42  ;;  %v1207_v28 = vsel %vm1156_vm1, %v1195_v21, 0.0  ;;  %v1209_v30 = vsel %vm1156_vm1, %v1196_v24, 0.0 }
  0x48   :  { %v1202_v23 = vadd.f32 %v1201_v19, %v1200_v18  ;;  %683 = vmatprep.subr.bf16.mxu1 %v1895_v7  ;;  %v1211_v34 = vsel %vm1156_vm1, %v1197_v27, 0.0 }
  0x4a   :  { %v1204_v26 = vadd.f32 %v1203_v22, %v1202_v23 }
  0x4c   :  { %v1206_v29 = vadd.f32 %v1205_v25, %v1204_v26 }
  0x4e   :  { %v1208_v33 = vadd.f32 %v1207_v28, %v1206_v29 }
  0x50   :  { %v1210_v35 = vadd.f32 %v1209_v30, %v1208_v33 }
  0x52   :  { %v2036_v36 = vadd.f32 %v1211_v34, %v1210_v35 }
  0x54   :  { %vm1215_vm5 = vcmp.eq.f32.partialorder %v2036_v36, inf  ;;  %vm1217_vm6 = vcmp.eq.f32.partialorder %v2036_v36, 0.0 }
  0xf6   :  { %v179_v39 = vpop.f32.mrf.mxu0 }
  0xf7   :  { %v2041_v40 = vadd.f32 %v1486_v37, %v179_v39 }
  0xf8   :  { %v1544_v41 = vpop.f32.mrf.mxu0 }
  0xf9   :  { %v195_v43 = vrot.slane %v2041_v40, %v1910_v13 }
  0xfa   :  { %v317_v44 = vpop.f32.mrf.mxu1  ;;  %v182_v45 = vpop.f32.mrf.mxu0 }
  0xfb   :  { %v2045_v46 = vadd.f32 %v1486_v37, %v182_v45  ;;  %v323_v47 = vadd.f32 %v317_v44, %v195_v43  ;;  %v203_v9 = vcombine.high %v195_v43, %v195_v43 }
  0xfc   :  { %v319_v48 = vpop.f32.mrf.mxu1  ;;  %v1545_v49 = vpop.f32.mrf.mxu0 }
  0xfd   :  { %1599 = vtanh.f32 %v323_v47  ;;  %v1497_v54 = vmul.f32 -1.442695, %v323_v47 }
  0xfe   :  { %v320_v50 = vpop.f32.mrf.mxu1 }
  0xff   :  { %1601 = vpow2.f32 %v1497_v54 }
 0x100   :  { %v321_v51 = vpop.f32.mrf.mxu1 }
 0x10a   :  { %v1600_v53 = vpop.eup %1599 }
 0x10b   :  { %333 = vrot.lane.b32.xlu0 %v1600_v53, %s1827_s22 }
 0x10c   :  { %v1602_v55 = vpop.eup %1601 }
 0x10d   :  { %v327_v56 = vadd.f32 1.0, %v1602_v55 }
 0x10f   :  { %1603 = vrcp.f32 %v327_v56 }
 0x11c   :  { %v1604_v57 = vpop.eup %1603 }
 0x11d   :  { %v331_v60 = vmul.f32 0.0, %v1604_v57 }
 0x17d   :  { %v334_v58 = vpop.permute.xlu0 %333 }
 0x17e   :  { %v336_v59 = vmul.f32 %v1604_v57, %v334_v58  ;;  %v188_v58 = vcombine.high %v2041_v40, %v2041_v40 }
 0x180   :  { %338 = vrot.lane.b32.xlu0 %v336_v59, %s1827_s22  ;;  %v2093_v59 = vrot.slane %v188_v58, %v1910_v13 }
 0x1f2   :  { %v339_v61 = vpop.permute.xlu0 %338 }
 0x1f3   :  { %v341_v62 = vadd.f32 %v339_v61, %v331_v60 }
 0x1f5   :  { %1605 = vtanh.f32 %v341_v62 }
 0x202   :  { %v1606_v63 = vpop.eup %1605 }
 0x203   :  { %344 = vrot.lane.b32.xlu1 %v1606_v63, %s1827_s22 }
 0x275   :  { %v345_v1 = vpop.permute.xlu1 %344 }
 0x276   :  { %v347_v2 = vmul.f32 %v1604_v57, %v345_v1 }
 0x278   :  { %349 = vrot.lane.b32.xlu1 %v347_v2, %s1819_s19 }
 0x2ea   :  { %v350_v3 = vpop.permute.xlu1 %349 }
 0x2eb   :  { %v353_v5 = vsel %vm352_vm3, %v350_v3, 0.0 }
 0x2ec   :  { %v354_v6 = vpack.c.bf16 %v353_v5, %v353_v5 }
 0x2ee   :  { %1498 = vmatmul.mubr.msk.bf16.vlgmr.msra.gmra.mxu0 %vm279_vm4, %v354_v6 }
 0x2ef   :  { %580 = vmatpush1.bf16.msra.mxu0 %v1897_v8  ;;  %603 = vmatprep.mubr.bf16.mxu0 %v1825_v4 }
 0x2f0   :  { %581 = vmatprep.subr.bf16.mxu0 %v1901_v10 }
 0x2f3   :  { %582 = vmatpush1.bf16.msra.mxu0 %v1903_v11 }
 0x2f4   :  { %583 = vmatprep.subr.bf16.mxu0 %v1966_v31 }
 0x2f7   :  { %584 = vmatpush1.bf16.msra.mxu0 %v1968_v32 }
 0x2f8   :  { %585 = vmatprep.subr.bf16.mxu0 %v1975_v38 }
 0x2fb   :  { %586 = vmatpush1.bf16.msra.mxu0 %v1980_v42 }
 0x2fc   :  { %787 = vmatprep.subr.bf16.mxu0 %v1895_v7 }
 0x3ae   :  { %v392_v12 = vpop.f32.mrf.mxu0 }
 0x3af   :  { %v399_v15 = vadd.f32 %v392_v12, %v203_v9 }
 0x3b0   :  { %v394_v16 = vpop.f32.mrf.mxu0 }
 0x3b1   :  { %1607 = vtanh.f32 %v399_v15  ;;  %v429_v17 = vadd.f32 %v2065_v14, %v394_v16  ;;  %v1499_v22 = vmul.f32 -1.442695, %v399_v15 }
 0x3b2   :  { %v396_v18 = vpop.f32.mrf.mxu0 }
 0x3b3   :  { %1609 = vtanh.f32 %v429_v17  ;;  %v1501_v23 = vmul.f32 -1.442695, %v429_v17 }
 0x3b4   :  { %v397_v19 = vpop.f32.mrf.mxu0  ;;  %1611 = vpow2.f32 %v1499_v22 }
 0x3b5   :  { %1613 = vpow2.f32 %v1501_v23 }
 0x3be   :  { %v1608_v20 = vpop.eup %1607 }
 0x3bf   :  { %409 = vrot.lane.b32.xlu0 %v1608_v20, %s1827_s22 }
 0x3c0   :  { %v1610_v21 = vpop.eup %1609 }
 0x3c1   :  { %439 = vrot.lane.b32.xlu1 %v1610_v21, %s1827_s22  ;;  %v1612_v24 = vpop.eup %1611 }
 0x3c2   :  { %v1614_v25 = vpop.eup %1613  ;;  %v403_v26 = vadd.f32 1.0, %v1612_v24 }
 0x3c3   :  { %v433_v27 = vadd.f32 1.0, %v1614_v25 }
 0x3c4   :  { %1615 = vrcp.f32 %v403_v26 }
 0x3c5   :  { %1617 = vrcp.f32 %v433_v27 }
 0x3d1   :  { %v1616_v28 = vpop.eup %1615 }
 0x3d2   :  { %v1618_v33 = vpop.eup %1617  ;;  %v407_v37 = vmul.f32 %v1616_v28, %v341_v62 }
 0x3d3   :  { %v437_v43 = vmul.f32 0.0, %v1618_v33 }
 0x431   :  { %v410_v29 = vpop.permute.xlu0 %409 }
 0x432   :  { %v412_v30 = vmul.f32 %v1616_v28, %v410_v29 }
 0x433   :  { %v440_v34 = vpop.permute.xlu1 %439 }
 0x434   :  { %414 = vrot.lane.b32.xlu0 %v412_v30, %s1827_s22  ;;  %v442_v35 = vmul.f32 %v1618_v33, %v440_v34 }
 0x436   :  { %444 = vrot.lane.b32.xlu1 %v442_v35, %s1827_s22 }
 0x4a6   :  { %v415_v39 = vpop.permute.xlu0 %414 }
 0x4a7   :  { %v2072_v41 = vadd.f32 %v415_v39, %v407_v37 }
 0x4a8   :  { %v445_v44 = vpop.permute.xlu1 %444 }
 0x4a9   :  { %1619 = vtanh.f32 %v2072_v41  ;;  %v447_v45 = vadd.f32 %v445_v44, %v437_v43 }
 0x4ab   :  { %1621 = vtanh.f32 %v447_v45 }
 0x4b6   :  { %v1620_v47 = vpop.eup %1619 }
 0x4b7   :  { %420 = vrot.lane.b32.xlu0 %v1620_v47, %s1827_s22 }
 0x4b8   :  { %v1622_v48 = vpop.eup %1621 }
 0x4b9   :  { %450 = vrot.lane.b32.xlu1 %v1622_v48, %s1827_s22 }
 0x529   :  { %v421_v49 = vpop.permute.xlu0 %420 }
 0x52a   :  { %v423_v50 = vmul.f32 %v1616_v28, %v421_v49 }
 0x52b   :  { %v451_v51 = vpop.permute.xlu1 %450 }
 0x52c   :  { %455 = vrot.lane.b32.xlu0 %v423_v50, %s1819_s19  ;;  %v453_v53 = vmul.f32 %v1618_v33, %v451_v51 }
 0x52e   :  { %459 = vrot.lane.b32.xlu1 %v453_v53, %s1828_s3 }
 0x59e   :  { %v456_v54 = vpop.permute.xlu0 %455 }
 0x5a0   :  { %v460_v55 = vpop.permute.xlu1 %459 }
 0x5a1   :  { %v462_v56 = vsel %vm352_vm3, %v456_v54, %v460_v55 }
 0x5a2   :  { %v463_v57 = vpack.c.bf16 %v462_v56, %v462_v56 }
 0x5a4   :  { %1502 = vmatmul.mubr.msk.bf16.vlgmr.msra.gmra.mxu1 %vm279_vm4, %v463_v57 }
 0x5a5   :  { %684 = vmatpush1.bf16.msra.mxu1 %v1897_v8  ;;  %707 = vmatprep.mubr.bf16.mxu1 %v1825_v4 }
 0x5a6   :  { %685 = vmatprep.subr.bf16.mxu1 %v1901_v10 }
 0x5a9   :  { %686 = vmatpush1.bf16.msra.mxu1 %v1903_v11 }
 0x5aa   :  { %687 = vmatprep.subr.bf16.mxu1 %v1966_v31 }
 0x5ad   :  { %688 = vmatpush1.bf16.msra.mxu1 %v1968_v32 }
 0x5ae   :  { %689 = vmatprep.subr.bf16.mxu1 %v1975_v38 }
 0x5b1   :  { %690 = vmatpush1.bf16.msra.mxu1 %v1980_v42 }
 0x5b2   :  { %891 = vmatprep.subr.bf16.mxu1 %v1895_v7 }
 0x664   :  { %v501_v60 = vpop.f32.mrf.mxu1 }
 0x665   :  { %v508_v61 = vadd.f32 %v501_v60, %v2093_v59 }
 0x666   :  { %v503_v62 = vpop.f32.mrf.mxu1 }
 0x667   :  { %1623 = vtanh.f32 %v508_v61  ;;  %v533_v63 = vadd.f32 %v2065_v14, %v503_v62  ;;  %v1503_v40 = vmul.f32 -1.442695, %v508_v61 }
 0x668   :  { %v505_v1 = vpop.f32.mrf.mxu1 }
 0x669   :  { %1625 = vtanh.f32 %v533_v63  ;;  %v1504_v6 = vmul.f32 -1.442695, %v533_v63 }
 0x66a   :  { %v506_v2 = vpop.f32.mrf.mxu1  ;;  %1627 = vpow2.f32 %v1503_v40 }
 0x66b   :  { %1629 = vpow2.f32 %v1504_v6 }
 0x674   :  { %v1624_v3 = vpop.eup %1623 }
 0x675   :  { %518 = vrot.lane.b32.xlu0 %v1624_v3, %s1827_s22 }
 0x676   :  { %v1626_v5 = vpop.eup %1625 }
 0x677   :  { %543 = vrot.lane.b32.xlu1 %v1626_v5, %s1827_s22  ;;  %v1628_v9 = vpop.eup %1627 }
 0x678   :  { %v1630_v12 = vpop.eup %1629  ;;  %v512_v15 = vadd.f32 1.0, %v1628_v9 }
 0x679   :  { %v537_v16 = vadd.f32 1.0, %v1630_v12 }
 0x67a   :  { %1631 = vrcp.f32 %v512_v15 }
 0x67b   :  { %1633 = vrcp.f32 %v537_v16 }
 0x687   :  { %v1632_v17 = vpop.eup %1631 }
 0x688   :  { %v1634_v20 = vpop.eup %1633  ;;  %v516_v23 = vmul.f32 %v1632_v17, %v2072_v41 }
 0x689   :  { %v541_v26 = vmul.f32 %v1634_v20, %v447_v45  ;;  %v204_v45 = vcombine.high %v2093_v59, %v2093_v59 }
 0x6e7   :  { %v519_v18 = vpop.permute.xlu0 %518 }
 0x6e8   :  { %v521_v19 = vmul.f32 %v1632_v17, %v519_v18 }
 0x6e9   :  { %v544_v21 = vpop.permute.xlu1 %543 }
 0x6ea   :  { %523 = vrot.lane.b32.xlu0 %v521_v19, %s1827_s22  ;;  %v546_v22 = vmul.f32 %v1634_v20, %v544_v21 }
 0x6ec   :  { %548 = vrot.lane.b32.xlu1 %v546_v22, %s1827_s22 }
 0x75c   :  { %v524_v24 = vpop.permute.xlu0 %523 }
 0x75d   :  { %v526_v25 = vadd.f32 %v524_v24, %v516_v23 }
 0x75e   :  { %v549_v27 = vpop.permute.xlu1 %548 }
 0x75f   :  { %1635 = vtanh.f32 %v526_v25  ;;  %v551_v28 = vadd.f32 %v549_v27, %v541_v26  ;;  %v2141_v27 = vrot.slane %v2045_v46, %v1910_v13 }
 0x761   :  { %1637 = vtanh.f32 %v551_v28 }
 0x76c   :  { %v1636_v29 = vpop.eup %1635 }
 0x76d   :  { %529 = vrot.lane.b32.xlu0 %v1636_v29, %s1827_s22 }
 0x76e   :  { %v1638_v30 = vpop.eup %1637 }
 0x76f   :  { %554 = vrot.lane.b32.xlu1 %v1638_v30, %s1827_s22 }
 0x7df   :  { %v530_v33 = vpop.permute.xlu0 %529 }
 0x7e0   :  { %v532_v34 = vmul.f32 %v1632_v17, %v530_v33 }
 0x7e1   :  { %v555_v35 = vpop.permute.xlu1 %554 }
 0x7e2   :  { %559 = vrot.lane.b32.xlu0 %v532_v34, %s1819_s19  ;;  %v557_v37 = vmul.f32 %v1634_v20, %v555_v35 }
 0x7e4   :  { %563 = vrot.lane.b32.xlu1 %v557_v37, %s1828_s3 }
 0x854   :  { %v560_v39 = vpop.permute.xlu0 %559 }
 0x856   :  { %v564_v41 = vpop.permute.xlu1 %563 }
 0x857   :  { %v566_v43 = vsel %vm352_vm3, %v560_v39, %v564_v41 }
 0x858   :  { %v567_v44 = vpack.c.bf16 %v566_v43, %v566_v43 }
 0x85a   :  { %1505 = vmatmul.mubr.msk.bf16.vlgmr.msra.gmra.mxu0 %vm279_vm4, %v567_v44 }
 0x85b   :  { %788 = vmatpush1.bf16.msra.mxu0 %v1897_v8  ;;  %811 = vmatprep.mubr.bf16.mxu0 %v1825_v4 }
 0x85c   :  { %789 = vmatprep.subr.bf16.mxu0 %v1901_v10 }
 0x85f   :  { %790 = vmatpush1.bf16.msra.mxu0 %v1903_v11 }
 0x860   :  { %791 = vmatprep.subr.bf16.mxu0 %v1966_v31 }
 0x863   :  { %792 = vmatpush1.bf16.msra.mxu0 %v1968_v32 }
 0x864   :  { %793 = vmatprep.subr.bf16.mxu0 %v1975_v38 }
 0x867   :  { %794 = vmatpush1.bf16.msra.mxu0 %v1980_v42 }
 0x868   :  { %995 = vmatprep.subr.bf16.mxu0 %v1895_v7 }
 0x91a   :  { %v605_v47 = vpop.f32.mrf.mxu0 }
 0x91b   :  { %v612_v48 = vadd.f32 %v605_v47, %v204_v45 }
 0x91c   :  { %v607_v49 = vpop.f32.mrf.mxu0 }
 0x91d   :  { %1639 = vtanh.f32 %v612_v48  ;;  %v637_v50 = vadd.f32 %v2065_v14, %v607_v49  ;;  %v1506_v56 = vmul.f32 -1.442695, %v612_v48 }
 0x91e   :  { %v609_v51 = vpop.f32.mrf.mxu0 }
 0x91f   :  { %1641 = vtanh.f32 %v637_v50  ;;  %v1507_v57 = vmul.f32 -1.442695, %v637_v50 }
 0x920   :  { %v610_v53 = vpop.f32.mrf.mxu0  ;;  %1643 = vpow2.f32 %v1506_v56 }
 0x921   :  { %1645 = vpow2.f32 %v1507_v57 }
 0x92a   :  { %v1640_v54 = vpop.eup %1639 }
 0x92b   :  { %622 = vrot.lane.b32.xlu0 %v1640_v54, %s1827_s22 }
 0x92c   :  { %v1642_v55 = vpop.eup %1641 }
 0x92d   :  { %647 = vrot.lane.b32.xlu1 %v1642_v55, %s1827_s22  ;;  %v1644_v58 = vpop.eup %1643 }
 0x92e   :  { %v1646_v59 = vpop.eup %1645  ;;  %v616_v60 = vadd.f32 1.0, %v1644_v58 }
 0x92f   :  { %v641_v61 = vadd.f32 1.0, %v1646_v59 }
 0x930   :  { %1647 = vrcp.f32 %v616_v60 }
 0x931   :  { %1649 = vrcp.f32 %v641_v61 }
 0x93d   :  { %v1648_v62 = vpop.eup %1647 }
 0x93e   :  { %v1650_v2 = vpop.eup %1649  ;;  %v620_v40 = vmul.f32 %v1648_v62, %v526_v25 }
 0x93f   :  { %v645_v12 = vmul.f32 %v1650_v2, %v551_v28 }
 0x99d   :  { %v623_v63 = vpop.permute.xlu0 %622 }
 0x99e   :  { %v625_v1 = vmul.f32 %v1648_v62, %v623_v63 }
 0x99f   :  { %v648_v3 = vpop.permute.xlu1 %647 }
 0x9a0   :  { %627 = vrot.lane.b32.xlu0 %v625_v1, %s1827_s22  ;;  %v650_v5 = vmul.f32 %v1650_v2, %v648_v3 }
 0x9a2   :  { %652 = vrot.lane.b32.xlu1 %v650_v5, %s1827_s22 }
 0xa12   :  { %v628_v6 = vpop.permute.xlu0 %627 }
 0xa13   :  { %v630_v9 = vadd.f32 %v628_v6, %v620_v40 }
 0xa14   :  { %v653_v15 = vpop.permute.xlu1 %652 }
 0xa15   :  { %1651 = vtanh.f32 %v630_v9  ;;  %v655_v16 = vadd.f32 %v653_v15, %v645_v12  ;;  %v220_v12 = vcombine.high %v2141_v27, %v2141_v27 }
 0xa17   :  { %1653 = vtanh.f32 %v655_v16 }
 0xa22   :  { %v1652_v17 = vpop.eup %1651 }
 0xa23   :  { %633 = vrot.lane.b32.xlu0 %v1652_v17, %s1827_s22 }
 0xa24   :  { %v1654_v18 = vpop.eup %1653 }
 0xa25   :  { %658 = vrot.lane.b32.xlu1 %v1654_v18, %s1827_s22 }
 0xa95   :  { %v634_v19 = vpop.permute.xlu0 %633 }
 0xa96   :  { %v636_v20 = vmul.f32 %v1648_v62, %v634_v19 }
 0xa97   :  { %v659_v21 = vpop.permute.xlu1 %658 }
 0xa98   :  { %663 = vrot.lane.b32.xlu0 %v636_v20, %s1819_s19  ;;  %v661_v22 = vmul.f32 %v1650_v2, %v659_v21 }
 0xa9a   :  { %667 = vrot.lane.b32.xlu1 %v661_v22, %s1828_s3 }
 0xb0a   :  { %v664_v23 = vpop.permute.xlu0 %663 }
 0xb0c   :  { %v668_v24 = vpop.permute.xlu1 %667 }
 0xb0d   :  { %v670_v25 = vsel %vm352_vm3, %v664_v23, %v668_v24 }
 0xb0e   :  { %v671_v26 = vpack.c.bf16 %v670_v25, %v670_v25 }
 0xb10   :  { %1508 = vmatmul.mubr.msk.bf16.vlgmr.msra.gmra.mxu1 %vm279_vm4, %v671_v26 }
 0xb11   :  { %892 = vmatpush1.bf16.msra.mxu1 %v1897_v8  ;;  %915 = vmatprep.mubr.bf16.mxu1 %v1825_v4 }
 0xb12   :  { %893 = vmatprep.subr.bf16.mxu1 %v1901_v10 }
 0xb15   :  { %894 = vmatpush1.bf16.msra.mxu1 %v1903_v11 }
 0xb16   :  { %895 = vmatprep.subr.bf16.mxu1 %v1966_v31 }
 0xb19   :  { %896 = vmatpush1.bf16.msra.mxu1 %v1968_v32 }
 0xb1a   :  { %897 = vmatprep.subr.bf16.mxu1 %v1975_v38 }
 0xb1d   :  { %898 = vmatpush1.bf16.msra.mxu1 %v1980_v42 }
 0xb1e   :  { %1099 = vmatprep.subr.bf16.mxu1 %v1895_v7 }
 0xbd0   :  { %v709_v28 = vpop.f32.mrf.mxu1 }
 0xbd1   :  { %v716_v29 = vadd.f32 %v709_v28, %v2141_v27 }
 0xbd2   :  { %v711_v30 = vpop.f32.mrf.mxu1 }
 0xbd3   :  { %1655 = vtanh.f32 %v716_v29  ;;  %v741_v33 = vadd.f32 %v2065_v14, %v711_v30  ;;  %v1509_v7 = vmul.f32 -1.442695, %v716_v29 }
 0xbd4   :  { %v713_v34 = vpop.f32.mrf.mxu1 }
 0xbd5   :  { %1657 = vtanh.f32 %v741_v33  ;;  %v1510_v41 = vmul.f32 -1.442695, %v741_v33 }
 0xbd6   :  { %v714_v35 = vpop.f32.mrf.mxu1  ;;  %1659 = vpow2.f32 %v1509_v7 }
 0xbd7   :  { %1661 = vpow2.f32 %v1510_v41 }
 0xbe0   :  { %v1656_v37 = vpop.eup %1655 }
 0xbe1   :  { %726 = vrot.lane.b32.xlu0 %v1656_v37, %s1827_s22 }
 0xbe2   :  { %v1658_v39 = vpop.eup %1657 }
 0xbe3   :  { %751 = vrot.lane.b32.xlu1 %v1658_v39, %s1827_s22  ;;  %v1660_v43 = vpop.eup %1659 }
 0xbe4   :  { %v1662_v44 = vpop.eup %1661  ;;  %v720_v45 = vadd.f32 1.0, %v1660_v43 }
 0xbe5   :  { %v745_v47 = vadd.f32 1.0, %v1662_v44 }
 0xbe6   :  { %1663 = vrcp.f32 %v720_v45 }
 0xbe7   :  { %1665 = vrcp.f32 %v745_v47 }
 0xbf3   :  { %v1664_v48 = vpop.eup %1663 }
 0xbf4   :  { %v1666_v51 = vpop.eup %1665  ;;  %v724_v55 = vmul.f32 %v1664_v48, %v630_v9 }
 0xbf5   :  { %v749_v58 = vmul.f32 %v1666_v51, %v655_v16 }
 0xc53   :  { %v727_v49 = vpop.permute.xlu0 %726 }
 0xc54   :  { %v729_v50 = vmul.f32 %v1664_v48, %v727_v49 }
 0xc55   :  { %v752_v53 = vpop.permute.xlu1 %751 }
 0xc56   :  { %731 = vrot.lane.b32.xlu0 %v729_v50, %s1827_s22  ;;  %v754_v54 = vmul.f32 %v1666_v51, %v752_v53 }
 0xc58   :  { %756 = vrot.lane.b32.xlu1 %v754_v54, %s1827_s22 }
 0xcc8   :  { %v732_v56 = vpop.permute.xlu0 %731 }
 0xcc9   :  { %v734_v57 = vadd.f32 %v732_v56, %v724_v55 }
 0xcca   :  { %v757_v59 = vpop.permute.xlu1 %756 }
 0xccb   :  { %1667 = vtanh.f32 %v734_v57  ;;  %v759_v60 = vadd.f32 %v757_v59, %v749_v58  ;;  %v205_v58 = vcombine.high %v2045_v46, %v2045_v46 }
 0xccd   :  { %1669 = vtanh.f32 %v759_v60  ;;  %v219_v59 = vrot.slane %v205_v58, %v1910_v13 }
 0xcd8   :  { %v1668_v61 = vpop.eup %1667 }
 0xcd9   :  { %737 = vrot.lane.b32.xlu0 %v1668_v61, %s1827_s22 }
 0xcda   :  { %v1670_v62 = vpop.eup %1669 }
 0xcdb   :  { %762 = vrot.lane.b32.xlu1 %v1670_v62, %s1827_s22 }
 0xd4b   :  { %v738_v63 = vpop.permute.xlu0 %737 }
 0xd4c   :  { %v740_v1 = vmul.f32 %v1664_v48, %v738_v63 }
 0xd4d   :  { %v763_v2 = vpop.permute.xlu1 %762 }
 0xd4e   :  { %767 = vrot.lane.b32.xlu0 %v740_v1, %s1819_s19  ;;  %v765_v3 = vmul.f32 %v1666_v51, %v763_v2 }
 0xd50   :  { %771 = vrot.lane.b32.xlu1 %v765_v3, %s1828_s3 }
 0xdc0   :  { %v768_v5 = vpop.permute.xlu0 %767 }
 0xdc2   :  { %v772_v40 = vpop.permute.xlu1 %771 }
 0xdc3   :  { %v774_v6 = vsel %vm352_vm3, %v768_v5, %v772_v40 }
 0xdc4   :  { %v775_v9 = vpack.c.bf16 %v774_v6, %v774_v6 }
 0xdc6   :  { %1511 = vmatmul.mubr.msk.bf16.vlgmr.msra.gmra.mxu0 %vm279_vm4, %v775_v9 }
 0xdc7   :  { %996 = vmatpush1.bf16.msra.mxu0 %v1897_v8  ;;  %1019 = vmatprep.mubr.bf16.mxu0 %v1825_v4 }
 0xdc8   :  { %997 = vmatprep.subr.bf16.mxu0 %v1901_v10 }
 0xdcb   :  { %998 = vmatpush1.bf16.msra.mxu0 %v1903_v11 }
 0xdcc   :  { %999 = vmatprep.subr.bf16.mxu0 %v1966_v31 }
 0xdcf   :  { %1000 = vmatpush1.bf16.msra.mxu0 %v1968_v32 }
 0xdd0   :  { %1001 = vmatprep.subr.bf16.mxu0 %v1975_v38 }
 0xdd3   :  { %1002 = vmatpush1.bf16.msra.mxu0 %v1980_v42 }
 0xdd4   :  { %1546 = vmatprep.subr.mxu0 %v1822_v0 }
 0xe86   :  { %v813_v15 = vpop.f32.mrf.mxu0 }
 0xe87   :  { %v820_v16 = vadd.f32 %v813_v15, %v220_v12 }
 0xe88   :  { %v815_v17 = vpop.f32.mrf.mxu0 }
 0xe89   :  { %1671 = vtanh.f32 %v820_v16  ;;  %v845_v18 = vadd.f32 %v2065_v14, %v815_v17  ;;  %v1512_v23 = vmul.f32 -1.442695, %v820_v16 }
 0xe8a   :  { %v817_v19 = vpop.f32.mrf.mxu0 }
 0xe8b   :  { %1673 = vtanh.f32 %v845_v18  ;;  %v1513_v24 = vmul.f32 -1.442695, %v845_v18 }
 0xe8c   :  { %v818_v20 = vpop.f32.mrf.mxu0  ;;  %1675 = vpow2.f32 %v1512_v23 }
 0xe8d   :  { %1677 = vpow2.f32 %v1513_v24 }
 0xe96   :  { %v1672_v21 = vpop.eup %1671 }
 0xe97   :  { %830 = vrot.lane.b32.xlu0 %v1672_v21, %s1827_s22 }
 0xe98   :  { %v1674_v22 = vpop.eup %1673 }
 0xe99   :  { %855 = vrot.lane.b32.xlu1 %v1674_v22, %s1827_s22  ;;  %v1676_v25 = vpop.eup %1675 }
 0xe9a   :  { %v1678_v26 = vpop.eup %1677  ;;  %v824_v27 = vadd.f32 1.0, %v1676_v25 }
 0xe9b   :  { %v849_v28 = vadd.f32 1.0, %v1678_v26 }
 0xe9c   :  { %1679 = vrcp.f32 %v824_v27 }
 0xe9d   :  { %1681 = vrcp.f32 %v849_v28 }
 0xea9   :  { %v1680_v29 = vpop.eup %1679 }
 0xeaa   :  { %v1682_v34 = vpop.eup %1681  ;;  %v828_v39 = vmul.f32 %v1680_v29, %v734_v57 }
 0xeab   :  { %v853_v43 = vmul.f32 %v1682_v34, %v759_v60 }
 0xf09   :  { %v831_v30 = vpop.permute.xlu0 %830 }
 0xf0a   :  { %v833_v33 = vmul.f32 %v1680_v29, %v831_v30 }
 0xf0b   :  { %v856_v35 = vpop.permute.xlu1 %855 }
 0xf0c   :  { %835 = vrot.lane.b32.xlu0 %v833_v33, %s1827_s22  ;;  %v858_v37 = vmul.f32 %v1682_v34, %v856_v35 }
 0xf0e   :  { %860 = vrot.lane.b32.xlu1 %v858_v37, %s1827_s22 }
 0xf7e   :  { %v836_v7 = vpop.permute.xlu0 %835 }
 0xf7f   :  { %v838_v41 = vadd.f32 %v836_v7, %v828_v39 }
 0xf80   :  { %v861_v44 = vpop.permute.xlu1 %860 }
 0xf81   :  { %1683 = vtanh.f32 %v838_v41  ;;  %v863_v45 = vadd.f32 %v861_v44, %v853_v43 }
 0xf83   :  { %1685 = vtanh.f32 %v863_v45 }
 0xf8e   :  { %v1684_v47 = vpop.eup %1683 }
 0xf8f   :  { %841 = vrot.lane.b32.xlu0 %v1684_v47, %s1827_s22 }
 0xf90   :  { %v1686_v48 = vpop.eup %1685 }
 0xf91   :  { %866 = vrot.lane.b32.xlu1 %v1686_v48, %s1827_s22 }
0x1001   :  { %v842_v49 = vpop.permute.xlu0 %841 }
0x1002   :  { %v844_v50 = vmul.f32 %v1680_v29, %v842_v49  ;;  %v221_v29 = vcombine.high %v219_v59, %v219_v59 }
0x1003   :  { %v867_v51 = vpop.permute.xlu1 %866 }
0x1004   :  { %871 = vrot.lane.b32.xlu0 %v844_v50, %s1819_s19  ;;  %v869_v53 = vmul.f32 %v1682_v34, %v867_v51 }
0x1006   :  { %875 = vrot.lane.b32.xlu1 %v869_v53, %s1828_s3 }
0x1076   :  { %v872_v54 = vpop.permute.xlu0 %871 }
0x1078   :  { %v876_v55 = vpop.permute.xlu1 %875 }
0x1079   :  { %v878_v56 = vsel %vm352_vm3, %v872_v54, %v876_v55 }
0x107a   :  { %v879_v57 = vpack.c.bf16 %v878_v56, %v878_v56 }
0x107c   :  { %1514 = vmatmul.mubr.msk.bf16.vlgmr.msra.gmra.mxu1 %vm279_vm4, %v879_v57 }
0x107d   :  { %1100 = vmatpush1.bf16.msra.mxu1 %v1897_v8  ;;  %1123 = vmatprep.mubr.bf16.mxu1 %v1825_v4 }
0x107e   :  { %1101 = vmatprep.subr.bf16.mxu1 %v1901_v10 }
0x1081   :  { %1102 = vmatpush1.bf16.msra.mxu1 %v1903_v11 }
0x1082   :  { %1103 = vmatprep.subr.bf16.mxu1 %v1966_v31 }
0x1085   :  { %1104 = vmatpush1.bf16.msra.mxu1 %v1968_v32 }
0x1086   :  { %1105 = vmatprep.subr.bf16.mxu1 %v1975_v38 }
0x1089   :  { %1106 = vmatpush1.bf16.msra.mxu1 %v1980_v42 }
0x113c   :  { %v917_v8 = vpop.f32.mrf.mxu1 }
0x113d   :  { %v924_v60 = vadd.f32 %v917_v8, %v219_v59 }
0x113e   :  { %v919_v4 = vpop.f32.mrf.mxu1 }
0x113f   :  { %1687 = vtanh.f32 %v924_v60  ;;  %v949_v10 = vadd.f32 %v2065_v14, %v919_v4  ;;  %v1515_v38 = vmul.f32 -1.442695, %v924_v60 }
0x1140   :  { %v921_v11 = vpop.f32.mrf.mxu1 }
0x1141   :  { %1689 = vtanh.f32 %v949_v10  ;;  %v1516_v42 = vmul.f32 -1.442695, %v949_v10 }
0x1142   :  { %v922_v31 = vpop.f32.mrf.mxu1  ;;  %1691 = vpow2.f32 %v1515_v38 }
0x1143   :  { %1693 = vpow2.f32 %v1516_v42 }
0x114c   :  { %v1688_v61 = vpop.eup %1687 }
0x114d   :  { %934 = vrot.lane.b32.xlu0 %v1688_v61, %s1827_s22 }
0x114e   :  { %v1690_v32 = vpop.eup %1689 }
0x114f   :  { %959 = vrot.lane.b32.xlu1 %v1690_v32, %s1827_s22  ;;  %v1692_v13 = vpop.eup %1691 }
0x1150   :  { %v1694_v46 = vpop.eup %1693  ;;  %v928_v62 = vadd.f32 1.0, %v1692_v13 }
0x1151   :  { %v953_v63 = vadd.f32 1.0, %v1694_v46 }
0x1152   :  { %1695 = vrcp.f32 %v928_v62 }
0x1153   :  { %1697 = vrcp.f32 %v953_v63 }
0x115f   :  { %v1696_v1 = vpop.eup %1695 }
0x1160   :  { %v1698_v5 = vpop.eup %1697  ;;  %v932_v9 = vmul.f32 %v1696_v1, %v838_v41 }
0x1161   :  { %v957_v16 = vmul.f32 %v1698_v5, %v863_v45 }
0x11bf   :  { %v935_v2 = vpop.permute.xlu0 %934 }
0x11c0   :  { %v937_v3 = vmul.f32 %v1696_v1, %v935_v2 }
0x11c1   :  { %v960_v40 = vpop.permute.xlu1 %959 }
0x11c2   :  { %939 = vrot.lane.b32.xlu0 %v937_v3, %s1827_s22  ;;  %v962_v6 = vmul.f32 %v1698_v5, %v960_v40 }
0x11c4   :  { %964 = vrot.lane.b32.xlu1 %v962_v6, %s1827_s22 }
0x1234   :  { %v940_v12 = vpop.permute.xlu0 %939 }
0x1235   :  { %v942_v15 = vadd.f32 %v940_v12, %v932_v9 }
0x1236   :  { %v965_v17 = vpop.permute.xlu1 %964 }
0x1237   :  { %1699 = vtanh.f32 %v942_v15  ;;  %v967_v18 = vadd.f32 %v965_v17, %v957_v16 }
0x1239   :  { %1701 = vtanh.f32 %v967_v18 }
0x1244   :  { %v1700_v19 = vpop.eup %1699 }
0x1245   :  { %945 = vrot.lane.b32.xlu0 %v1700_v19, %s1827_s22  ;;  %v1222_v19 = vld [vmem:[#allocation7] sm:$0xff] }
0x1246   :  { %v1702_v20 = vpop.eup %1701 }
0x1247   :  { %970 = vrot.lane.b32.xlu1 %v1702_v20, %s1827_s22  ;;  %v1218_v20 = vand.u32 2147483648, %v2036_v36 }
0x12b7   :  { %v946_v21 = vpop.permute.xlu0 %945 }
0x12b8   :  { %v948_v22 = vmul.f32 %v1696_v1, %v946_v21 }
0x12b9   :  { %v971_v23 = vpop.permute.xlu1 %970 }
0x12ba   :  { %975 = vrot.lane.b32.xlu0 %v948_v22, %s1819_s19  ;;  %v973_v24 = vmul.f32 %v1698_v5, %v971_v23  ;;  %v1221_v23 = vld [vmem:[%s2269_s4 + $0x8] sm:$0xff] }
0x12bc   :  { %979 = vrot.lane.b32.xlu1 %v973_v24, %s1828_s3 }
0x132c   :  { %v976_v25 = vpop.permute.xlu0 %975 }
0x132e   :  { %v980_v26 = vpop.permute.xlu1 %979 }
0x132f   :  { %v982_v27 = vsel %vm352_vm3, %v976_v25, %v980_v26  ;;  %v1220_v25 = vld [vmem:[%s2269_s4] sm:$0xff] }
0x1330   :  { %v983_v28 = vpack.c.bf16 %v982_v27, %v982_v27 }
0x1332   :  { %1517 = vmatmul.mubr.msk.bf16.vlgmr.msra.gmra.mxu0 %vm279_vm4, %v983_v28  ;;  %v1387_v28 = vld [vmem:[%s2272_s7 + $0x18] sm:$0xff] }
0x1333   :  { %1550 = vmatprep.mubr.msk.f32.mxu0 %vm1823_vm0, %v1822_v0 }
0x13f2   :  { %v1021_v30 = vpop.f32.mrf.mxu0 }
0x13f3   :  { %v1028_v33 = vadd.f32 %v1021_v30, %v221_v29  ;;  %v1386_v29 = vld [vmem:[%s2272_s7 + $0x10] sm:$0xff] }
0x13f4   :  { %v1023_v34 = vpop.f32.mrf.mxu0 }
0x13f5   :  { %1703 = vtanh.f32 %v1028_v33  ;;  %v1053_v35 = vadd.f32 %v2065_v14, %v1023_v34  ;;  %v1518_v43 = vmul.f32 -1.442695, %v1028_v33 }
0x13f6   :  { %v1025_v37 = vpop.f32.mrf.mxu0 }
0x13f7   :  { %1705 = vtanh.f32 %v1053_v35  ;;  %v1519_v44 = vmul.f32 -1.442695, %v1053_v35 }
0x13f8   :  { %v1026_v39 = vpop.f32.mrf.mxu0  ;;  %1707 = vpow2.f32 %v1518_v43 }
0x13f9   :  { %1709 = vpow2.f32 %v1519_v44 }
0x1402   :  { %v1704_v7 = vpop.eup %1703 }
0x1403   :  { %1038 = vrot.lane.b32.xlu0 %v1704_v7, %s1827_s22  ;;  %v1384_v7 = vld [vmem:[%s2272_s7] sm:$0xff] }
0x1404   :  { %v1706_v41 = vpop.eup %1705 }
0x1405   :  { %1063 = vrot.lane.b32.xlu1 %v1706_v41, %s1827_s22  ;;  %v1708_v45 = vpop.eup %1707 }
0x1406   :  { %v1710_v47 = vpop.eup %1709  ;;  %v1032_v48 = vadd.f32 1.0, %v1708_v45 }
0x1407   :  { %v1057_v49 = vadd.f32 1.0, %v1710_v47 }
0x1408   :  { %1711 = vrcp.f32 %v1032_v48 }
0x1409   :  { %1713 = vrcp.f32 %v1057_v49  ;;  %v1525_v49 = vld [vmem:[%s2273_s8] ss:$0 sm:$0xff] }
0x1415   :  { %v1712_v50 = vpop.eup %1711 }
0x1416   :  { %v1714_v54 = vpop.eup %1713  ;;  %v1036_v57 = vmul.f32 %v1712_v50, %v942_v15 }
0x1417   :  { %v1061_v8 = vmul.f32 %v1714_v54, %v967_v18  ;;  %v1223_v18 = vld [vmem:[#allocation7 + $0x8] sm:$0xff] }
0x1418   :  { %1547 = vmatpush3.msra.mxu0 %v1223_v18 }
0x1419   :  { %1548 = vmatprep.subr.mxu0 %v1822_v0 }
0x141a   :  { %1549 = vmatpush3.msra.mxu0 %v1222_v19 }
0x141b   :  { %1553 = vmatprep.subr.mxu0 %v1822_v0 }
0x1475   :  { %v1039_v51 = vpop.permute.xlu0 %1038 }
0x1476   :  { %v1041_v53 = vmul.f32 %v1712_v50, %v1039_v51 }
0x1477   :  { %v1064_v55 = vpop.permute.xlu1 %1063 }
0x1478   :  { %1043 = vrot.lane.b32.xlu0 %v1041_v53, %s1827_s22  ;;  %v1066_v56 = vmul.f32 %v1714_v54, %v1064_v55 }
0x147a   :  { %1068 = vrot.lane.b32.xlu1 %v1066_v56, %s1827_s22 }
0x14ea   :  { %v1044_v58 = vpop.permute.xlu0 %1043 }
0x14eb   :  { %v1046_v59 = vadd.f32 %v1044_v58, %v1036_v57 }
0x14ec   :  { %v1069_v60 = vpop.permute.xlu1 %1068 }
0x14ed   :  { %1715 = vtanh.f32 %v1046_v59  ;;  %v1071_v4 = vadd.f32 %v1069_v60, %v1061_v8 }
0x14ef   :  { %1717 = vtanh.f32 %v1071_v4 }
0x14fa   :  { %v1716_v10 = vpop.eup %1715 }
0x14fb   :  { %1049 = vrot.lane.b32.xlu0 %v1716_v10, %s1827_s22 }
0x14fc   :  { %v1718_v11 = vpop.eup %1717 }
0x14fd   :  { %1074 = vrot.lane.b32.xlu1 %v1718_v11, %s1827_s22 }
0x156d   :  { %v1050_v31 = vpop.permute.xlu0 %1049 }
0x156e   :  { %v1052_v61 = vmul.f32 %v1712_v50, %v1050_v31 }
0x156f   :  { %v1075_v32 = vpop.permute.xlu1 %1074 }
0x1570   :  { %1079 = vrot.lane.b32.xlu0 %v1052_v61, %s1819_s19  ;;  %v1077_v38 = vmul.f32 %v1714_v54, %v1075_v32 }
0x1572   :  { %1083 = vrot.lane.b32.xlu1 %v1077_v38, %s1828_s3 }
0x15e2   :  { %v1080_v42 = vpop.permute.xlu0 %1079 }
0x15e4   :  { %v1084_v13 = vpop.permute.xlu1 %1083 }
0x15e5   :  { %v1086_v46 = vsel %vm352_vm3, %v1080_v42, %v1084_v13 }
0x15e6   :  { %v1087_v62 = vpack.c.bf16 %v1086_v46, %v1086_v46 }
0x15e8   :  { %1520 = vmatmul.mubr.msk.bf16.vlgmr.msra.gmra.mxu1 %vm279_vm4, %v1087_v62 }
0x16a8   :  { %v1125_v63 = vpop.f32.mrf.mxu1 }
0x16aa   :  { %v1126_v1 = vpop.f32.mrf.mxu1 }
0x16ab   :  { %v1131_v2 = vadd.f32 %v2065_v14, %v1126_v1 }
0x16ac   :  { %v1128_v3 = vpop.f32.mrf.mxu1 }
0x16ad   :  { %1719 = vtanh.f32 %v1131_v2  ;;  %v1521_v6 = vmul.f32 -1.442695, %v1131_v2 }
0x16ae   :  { %v1129_v5 = vpop.f32.mrf.mxu1 }
0x16af   :  { %1721 = vpow2.f32 %v1521_v6 }
0x16ba   :  { %v1720_v40 = vpop.eup %1719 }
0x16bb   :  { %1141 = vrot.lane.b32.xlu0 %v1720_v40, %s1827_s22 }
0x16bc   :  { %v1722_v9 = vpop.eup %1721 }
0x16bd   :  { %v1135_v12 = vadd.f32 1.0, %v1722_v9 }
0x16bf   :  { %1723 = vrcp.f32 %v1135_v12 }
0x16c0   :  { %1725 = vrsqrt.f32 %v2036_v36 }
0x16cc   :  { %v1724_v15 = vpop.eup %1723 }
0x16cd   :  { %v1726_v14 = vpop.eup %1725 }
0x16ce   :  { %v1214_v21 = vmul.f32 %v1726_v14, %v2036_v36 }
0x16d0   :  { %v1216_v22 = vsel %vm1215_vm5, %v2036_v36, %v1214_v21  ;;  %v1139_v36 = vmul.f32 %v1724_v15, %v1071_v4 }
0x16d1   :  { %v1219_v24 = vsel %vm1217_vm6, %v1218_v20, %v1216_v22 }
0x16d2   :  { %1551 = vmatmul.mubr.msk.f32.vlgmr.msra.gmra.mxu0 %vm141_vm2, %v1219_v24 }
0x16d3   :  { %1554 = vmatpush3.msra.mxu0 %v1221_v23  ;;  %1557 = vmatprep.mubr.msk.f32.mxu0 %vm1823_vm0, %v1822_v0 }
0x16d4   :  { %1555 = vmatprep.subr.mxu0 %v1822_v0 }
0x16d5   :  { %1556 = vmatpush3.msra.mxu0 %v1220_v25 }
0x16d6   :  { %1558 = vmatmul.mubr.msk.f32.vlgmr.msra.gmra.mxu0 %vm141_vm2, %v1999_v52  ;;  %1560 = vmatprep.subr.mxu0 %v1822_v0  ;;  %v1385_v52 = vld [vmem:[%s2272_s7 + $0x8] sm:$0xff]  ;;  %s1829_s7 = smov [#allocation8]  }
0x16d7   :  { %1568 = vmatprep.mubr.msk.f32.mxu0 %vm1823_vm0, %v1822_v0  ;;  %1561 = vmatpush3.msra.mxu0 %v1387_v28  ;;  %s1476_s16 = sshll.u32 %s1829_s7, 4  ;;  %s1477_s16 = int_to_ptr.vmem [resolvable:$true] %s1476_s16 }
0x16d8   :  { %1562 = vmatprep.subr.mxu0 %v1822_v0  ;;  %p1794_p2 = scmp.lt.s32.totalorder %s1477_s16, %s1477_s16 }
0x16d9   :  { %1563 = vmatpush3.msra.mxu0 %v1386_v29 }
0x16da   :  { %1564 = vmatprep.subr.mxu0 %v1822_v0 }
0x16db   :  { %1565 = vmatpush3.msra.mxu0 %v1385_v52 }
0x16dc   :  { %1566 = vmatprep.subr.mxu0 %v1822_v0  ;;  %v1524_v0 = vld [vmem:[%s2271_s6] ss:$0 sm:$0xff] }
0x16dd   :  { %1567 = vmatpush3.msra.mxu0 %v1384_v7 }
0x172d   :  { %v1142_v16 = vpop.permute.xlu0 %1141 }
0x172e   :  { %v1144_v17 = vmul.f32 %v1724_v15, %v1142_v16 }
0x1730   :  { %1146 = vrot.lane.b32.xlu1 %v1144_v17, %s1827_s22 }
0x1792   :  { %v1293_v33 = vpop.f32.mrf.mxu0 }
0x1794   :  { %v1552_v34 = vpop.f32.mrf.mxu0 }
0x1796   :  { %v1366_v35 = vpop.f32.mrf.mxu0 }
0x1797   :  { %v1367_v37 = vadd.f32 %v1366_v35, %v1293_v33 }
0x1798   :  { %v1559_v39 = vpop.f32.mrf.mxu0 }
0x1799   :  { %v1377_v44 = vadd.f32 %v1524_v0, %v1367_v37 }
0x179b   :  { %v1378_v45 = vmax.f32 %v1377_v44, 0.0 }
0x17a2   :  { %v1147_v26 = vpop.permute.xlu1 %1146 }
0x17a3   :  { %v1149_v27 = vadd.f32 %v1147_v26, %v1139_v36 }
0x17a5   :  { %1727 = vtanh.f32 %v1149_v27 }
0x17b2   :  { %v1728_v30 = vpop.eup %1727 }
0x17b3   :  { %1152 = vrot.lane.b32.xlu0 %v1728_v30, %s1827_s22 }
0x1825   :  { %v1153_v41 = vpop.permute.xlu0 %1152 }
0x1826   :  { %v1155_v43 = vmul.f32 %v1724_v15, %v1153_v41 }
0x1828   :  { %1380 = vrot.lane.b32.xlu1 %v1155_v43, %s1819_s19  ;;  %s1789_s19 = scalar_lea.vmem %s1477_s16, 32 }
0x1829   :  { %p1790_p1 = scmp.ne.s32.totalorder %s1477_s16, %s1789_s19  ;;  %p1795_p3 = scmp.lt.s32.totalorder %s1789_s19, %s1789_s19 }
0x182b   :  { %p1796_p4 = por %p1795_p3, %p1794_p2 }
0x182d   :  { %p1797_p5 = pnand %p1796_p4, %p1790_p1 }
0x189a   :  { %v1381_v47 = vpop.permute.xlu1 %1380 }
0x189b   :  { %v1383_v48 = vadd.f32 %v1381_v47, %v1378_v45 }
0x189d   :  { %1569 = vmatmul.mubr.msk.f32.vlgmr.msra.gmra.mxu0 %vm352_vm3, %v1383_v48 }
0x195d   :  { %v1464_v50 = vpop.f32.mrf.mxu0 }
0x195e   :  { %v1465_v51 = vadd.f32 %v1525_v49, %v1464_v50 }
0x195f   :  { %v1570_v53 = vpop.f32.mrf.mxu0 }
0x1960   :  { %1469 = vst.msk [vmem:[#allocation8] sm:$0x3] %vm1468_vm7, %v1465_v51 }
0x1961   :  { %1800 = shalt.err (!%p1797_p5)
}
0x1962   :  { %1479 = dma.vmem_to_hbm [thread:$0]  %s1477_s16, 32, %s2274_s9, [#allocation4]  }
0x1963   :  { %1813 = dma.done.wait [#allocation4], 32  }
0x1964   :  { %1814 = vsyncadd [#allocation4], 4294967264 }
0x1965   :  { %1483 = vsyncpa [#allocation3], 1 }
0x1966   :  { %1484 = vsyncpa [#allocation6], 1 }
0x1967   :  { %1485 = vsyncpa [#allocation4], 1 }

</bundles_post_ra>
